<compile_context>
chip_gen: v7x
topology: tpu7x:2x2x1
jax: 0.10.0
libtpu: 0.0.40
codegen_flags: <defaults>
</compile_context>

<pallas_src>
import numpy as np
import jax
import jax.numpy as jnp
from jax import lax
from jax.experimental import pallas as pl
from jax.experimental.pallas import tpu as pltpu


def _make_kernel(H, W, planes, nb):
    HW = H * W
    P = planes

    def kernel(x_ref, w1_ref, w2_ref, w3_ref, b1_ref, b2_ref, b3_ref, out_ref):
        Cin = x_ref.shape[1]

        # ---- layout: NCHW block -> (pixel, channel) rows (per-image 2-D transpose,
        #      done in VMEM on the XLU; no HBM transpose pass in the wrapper) ----
        if nb == 1:
            x2d = x_ref[0].T                                           # (HW, Cin) f32
        else:
            x2d = jnp.concatenate([x_ref[i].T for i in range(nb)], axis=0)

        # ---- conv1 (1x1, BN1 folded) + bias + relu ----
        h1 = jnp.dot(x2d.astype(jnp.bfloat16), w1_ref[...],
                     preferred_element_type=jnp.float32)               # (nb*HW, P)
        h1 = jnp.maximum(h1 + b1_ref[...], 0.0)

        # ---- conv2 (3x3, stride=1, pad=1, BN2 folded): three accumulated K=3P matmuls ----
        h1_3d = h1.reshape(nb, HW, P)
        # Horizontal halo: zero the wrapped *source* columns once; shared by all
        # three ky taps of the corresponding kx (2 selects instead of 9).
        xcol = lax.broadcasted_iota(jnp.int32, (1, HW, 1), 1) % W
        bases = (jnp.where(xcol == (W - 1), 0.0, h1_3d),               # kx == 0 taps
                 h1_3d,                                                # kx == 1 taps
                 jnp.where(xcol == 0, 0.0, h1_3d))                     # kx == 2 taps

        def shift_rows(a, off):
            # b[:, i, :] = a[:, i + off, :] if 0 <= i + off < HW else 0 (per image)
            if off == 0:
                return a
            z = jnp.zeros((nb, abs(off), P), a.dtype)
            if off > 0:
                return jnp.concatenate([a[:, off:, :], z], axis=1)
            return jnp.concatenate([z, a[:, :HW + off, :]], axis=1)

        h2 = None
        for ky in range(3):
            # Taps go bf16 immediately after the shift; the concatenated slab
            # (the largest im2col object) is bf16 and only 3P wide.
            taps = [shift_rows(bases[kx], (ky - 1) * W + (kx - 1)).astype(jnp.bfloat16)
                    for kx in range(3)]
            slab = jnp.concatenate(taps, axis=-1).reshape(nb * HW, 3 * P)
            part = jnp.dot(slab, w2_ref[ky], preferred_element_type=jnp.float32)
            h2 = part if h2 is None else h2 + part
        h2 = jnp.maximum(h2 + b2_ref[...], 0.0)                        # (nb*HW, P)

        # ---- conv3 (1x1, BN3 folded) + bias, then residual + relu in NCHW layout ----
        h3 = jnp.dot(h2.astype(jnp.bfloat16), w3_ref[...],
                     preferred_element_type=jnp.float32) + b3_ref[...]  # (nb*HW, Cout)
        for i in range(nb):
            h3_i = h3[i * HW:(i + 1) * HW, :]                          # (HW, Cout)
            # Re-read x_ref (cheap vld) instead of keeping a transposed copy live.
            out_ref[i] = jnp.maximum(h3_i.T + x_ref[i], 0.0).astype(out_ref.dtype)

    return kernel


def _pick_nb(N, HW, Cin, P, Cout, budget_bytes):
    """Largest divisor of N (capped at N//2 so the grid keeps >=2 steps for
    megacore sharding) whose conservative per-step footprint fits the budget."""
    per_img = (
        4 * HW * (3 * Cin + 5 * Cout + 7 * P)   # f32: 2x-buffered x/out blocks, x2d,
                                                #      h1 + masked bases, ky taps, h2, h3
        + 2 * HW * (Cin + 7 * P)                # bf16: conv operands + per-ky slabs
    )
    cap = max(1, N // 2)
    nb = 1
    for d in range(1, cap + 1):
        if N % d == 0 and d * per_img <= budget_bytes:
            nb = d
    return nb


def bottleneck_pallas(x_nchw, raw):
    w1, w2_hwio, w3 = raw["w1"], raw["w2_hwio"], raw["w3"]
    s1, b1 = raw["s1"], raw["b1"]
    s2, b2 = raw["s2"], raw["b2"]
    s3, b3 = raw["s3"], raw["b3"]

    N, Cin, H, W = x_nchw.shape
    P = w1.shape[1]
    Cout = w3.shape[1]
    assert Cout == Cin, "downsample=None requires inplanes == planes * expansion"
    HW = H * W

    # Fold BN (inference) scales into the conv weights; cast weights to bf16.
    w1f = (w1 * s1[None, :]).astype(jnp.bfloat16)                        # (Cin, P)
    # (ky, kx, ci, co) -> (ky, kx*P + ci, co): one contiguous (3P, P) slab per ky.
    w2f = (w2_hwio * s2[None, None, None, :]).reshape(3, 3 * P, P)
    w2f = w2f.astype(jnp.bfloat16)
    w3f = (w3 * s3[None, :]).astype(jnp.bfloat16)                        # (P, Cout)
    b1m = b1.reshape(1, P).astype(jnp.float32)
    b2m = b2.reshape(1, P).astype(jnp.float32)
    b3m = b3.reshape(1, Cout).astype(jnp.float32)

    # VMEM budgeting: 32 MiB scoped limit is safe on every generation (v7x has
    # only 64 MiB/core). Subtract the double-buffered weight footprint before
    # deciding how many images to process per grid step.
    vmem_limit = 32 * 1024 * 1024
    weight_buf = 2 * 2 * (Cin * P + 9 * P * P + P * Cout)                # bf16, 2 buffers
    act_budget = max(4 * 1024 * 1024, vmem_limit // 2 - weight_buf)
    nb = _pick_nb(N, HW, Cin, P, Cout, act_budget)
    assert N % nb == 0

    # Free reshape only -- no HBM transpose pass; layout handled in-kernel.
    x = x_nchw.reshape(N, Cin, HW)
    kernel = _make_kernel(H, W, P, nb)

    out = pl.pallas_call(
        kernel,
        out_shape=jax.ShapeDtypeStruct((N, Cout, HW), jnp.float32),
        grid_spec=pltpu.PrefetchScalarGridSpec(
            num_scalar_prefetch=0,
            grid=(N // nb,),
            in_specs=[
                pl.BlockSpec((nb, Cin, HW), lambda n: (n, 0, 0)),    # x (NCHW, HW flat)
                pl.BlockSpec((Cin, P), lambda n: (0, 0)),            # w1 (BN folded)
                pl.BlockSpec((3, 3 * P, P), lambda n: (0, 0, 0)),    # w2 per-ky slabs
                pl.BlockSpec((P, Cout), lambda n: (0, 0)),           # w3 (BN folded)
                pl.BlockSpec((1, P), lambda n: (0, 0)),              # bn1 bias
                pl.BlockSpec((1, P), lambda n: (0, 0)),              # bn2 bias
                pl.BlockSpec((1, Cout), lambda n: (0, 0)),           # bn3 bias
            ],
            out_specs=pl.BlockSpec((nb, Cout, HW), lambda n: (n, 0, 0)),
        ),
        compiler_params=pltpu.CompilerParams(
            dimension_semantics=("parallel",),
            vmem_limit_bytes=vmem_limit,
        ),
    )(x, w1f, w2f, w3f, b1m, b2m, b3m)

    return out.reshape(N, Cout, H, W)


def make_params(key, inplanes, planes, expansion=4):
    ks = jax.random.split(key, 6)
    w1 = 0.1 * jax.random.normal(ks[0], (inplanes, planes), jnp.float32)
    w2_hwio = 0.1 * jax.random.normal(ks[1], (3, 3, planes, planes), jnp.float32)
    w3 = 0.1 * jax.random.normal(ks[2], (planes, planes * expansion), jnp.float32)

    def bn_fold(k, c):
        k1, k2, k3, k4 = jax.random.split(k, 4)
        gamma = 1.0 + 0.1 * jax.random.normal(k1, (c,), jnp.float32)
        beta = 0.1 * jax.random.normal(k2, (c,), jnp.float32)
        mean = 0.1 * jax.random.normal(k3, (c,), jnp.float32)
        var = 1.0 + 0.1 * jax.random.uniform(k4, (c,), jnp.float32)
        eps = 1e-5
        scale = gamma / jnp.sqrt(var + eps)
        bias = beta - mean * scale
        return scale, bias

    s1, b1 = bn_fold(ks[3], planes)
    s2, b2 = bn_fold(ks[4], planes)
    s3, b3 = bn_fold(ks[5], planes * expansion)
    return dict(w1=w1, w2_hwio=w2_hwio, w3=w3,
                s1=s1, b1=b1, s2=s2, b2=b2, s3=s3, b3=b3)


def bottleneck_ref(x_nchw, raw):
    """Pure-JAX f32 reference (same semantics as the PyTorch module in eval mode)."""
    w1, w2_hwio, w3 = raw["w1"], raw["w2_hwio"], raw["w3"]
    s1, b1 = raw["s1"], raw["b1"]
    s2, b2 = raw["s2"], raw["b2"]
    s3, b3 = raw["s3"], raw["b3"]

    x = jnp.transpose(x_nchw, (0, 2, 3, 1))                         # NHWC
    h = jnp.einsum('nhwc,cp->nhwp', x, w1)
    h = jnp.maximum(h * s1.reshape(1, 1, 1, -1) + b1.reshape(1, 1, 1, -1), 0.0)
    h = lax.conv_general_dilated(h, w2_hwio, (1, 1), 'SAME',
                                 dimension_numbers=('NHWC', 'HWIO', 'NHWC'))
    h = jnp.maximum(h * s2.reshape(1, 1, 1, -1) + b2.reshape(1, 1, 1, -1), 0.0)
    h = jnp.einsum('nhwp,pq->nhwq', h, w3)
    h = h * s3.reshape(1, 1, 1, -1) + b3.reshape(1, 1, 1, -1)
    out = jnp.maximum(h + x, 0.0)
    return out.transpose(0, 3, 1, 2)


if __name__ == "__main__":
    # stride=1, downsample=None => inplanes must equal planes * expansion.
    N, H, W = 2, 16, 16
    planes = 4
    inplanes = planes * 4  # 16

    key = jax.random.PRNGKey(0)
    kx, kp = jax.random.split(key)
    x = jax.random.normal(kx, (N, inplanes, H, W), jnp.float32)     # NCHW, like PyTorch

    raw = make_params(kp, inplanes, planes)

    out = jax.block_until_ready(bottleneck_pallas(x, raw))
    ref = jax.block_until_ready(bottleneck_ref(x, raw))

    # bf16 matmul operands (f32 accumulation) -> slightly looser tolerance.
    np.testing.assert_allclose(np.asarray(out), np.asarray(ref), rtol=2e-2, atol=2e-2)

    print("KERNEL_OK")
</pallas_src>

<mosaic_0001>
module attributes {stable_mosaic.version = 11 : i64} {
  func.func @kernel(%arg0: i32, %arg1: memref<1x16x256xf32, #tpu.memory_space<vmem>>, %arg2: memref<16x4xbf16, #tpu.memory_space<vmem>>, %arg3: memref<3x12x4xbf16, #tpu.memory_space<vmem>>, %arg4: memref<4x16xbf16, #tpu.memory_space<vmem>>, %arg5: memref<1x4xf32, #tpu.memory_space<vmem>>, %arg6: memref<1x4xf32, #tpu.memory_space<vmem>>, %arg7: memref<1x16xf32, #tpu.memory_space<vmem>>, %arg8: memref<1x16x256xf32, #tpu.memory_space<vmem>>) attributes {dimension_semantics = [#tpu.dimension_semantics<parallel>], iteration_bounds = array<i64: 2>, scalar_prefetch = 0 : i64, scratch_operands = 0 : i64, tpu.core_type = #tpu.core_type<tc>, window_params = [{transform_indices = @transform_0, window_bounds = array<i64: 1, 16, 256>}, {pipeline_mode = #tpu.pipeline_mode<synchronous>, transform_indices = @transform_1, window_bounds = array<i64: 16, 4>}, {pipeline_mode = #tpu.pipeline_mode<synchronous>, transform_indices = @transform_2, window_bounds = array<i64: 3, 12, 4>}, {pipeline_mode = #tpu.pipeline_mode<synchronous>, transform_indices = @transform_3, window_bounds = array<i64: 4, 16>}, {pipeline_mode = #tpu.pipeline_mode<synchronous>, transform_indices = @transform_4, window_bounds = array<i64: 1, 4>}, {pipeline_mode = #tpu.pipeline_mode<synchronous>, transform_indices = @transform_5, window_bounds = array<i64: 1, 4>}, {pipeline_mode = #tpu.pipeline_mode<synchronous>, transform_indices = @transform_6, window_bounds = array<i64: 1, 16>}, {transform_indices = @transform_7, window_bounds = array<i64: 1, 16, 256>}]} {
    %c0 = arith.constant 0 : index
    %c0_0 = arith.constant 0 : index
    %c0_1 = arith.constant 0 : index
    %0 = vector.load %arg1[%c0, %c0_0, %c0_1] : memref<1x16x256xf32, #tpu.memory_space<vmem>>, vector<1x16x256xf32>
    %1 = vector.shape_cast %0 : vector<1x16x256xf32> to vector<16x256xf32>
    %2 = tpu.transpose %1, [1, 0] : vector<16x256xf32> -> vector<256x16xf32>
    %3 = arith.truncf %2 : vector<256x16xf32> to vector<256x16xbf16>
    %c0_2 = arith.constant 0 : index
    %c0_3 = arith.constant 0 : index
    %4 = vector.load %arg2[%c0_2, %c0_3] : memref<16x4xbf16, #tpu.memory_space<vmem>>, vector<16x4xbf16>
    %cst = arith.constant dense<0.000000e+00> : vector<256x4xf32>
    %5 = tpu.matmul %3, %4, %cst {dimension_numbers = #tpu.dot_dimension_numbers<[1], [0], [0], [1], [0, 0, 1, 1], [], []>} : vector<256x16xbf16>, vector<16x4xbf16>, vector<256x4xf32> -> vector<256x4xf32>
    %c0_4 = arith.constant 0 : index
    %c0_5 = arith.constant 0 : index
    %6 = vector.load %arg5[%c0_4, %c0_5] : memref<1x4xf32, #tpu.memory_space<vmem>>, vector<1x4xf32>
    %7 = vector.broadcast %6 : vector<1x4xf32> to vector<256x4xf32>
    %8 = arith.addf %5, %7 : vector<256x4xf32>
    %cst_6 = arith.constant 0.000000e+00 : f32
    %9 = vector.broadcast %cst_6 : f32 to vector<256x4xf32>
    %10 = arith.maximumf %8, %9 : vector<256x4xf32>
    %11 = vector.shape_cast %10 : vector<256x4xf32> to vector<1x256x4xf32>
    %12 = tpu.iota {dimensions = array<i32: 1>} : vector<1x256x1xi32>
    %c16_i32 = arith.constant 16 : i32
    %c0_i32 = arith.constant 0 : i32
    %13 = arith.cmpi eq, %c16_i32, %c0_i32 : i32
    %c1_i32 = arith.constant 1 : i32
    %14 = arith.select %13, %c1_i32, %c16_i32 : i32
    %15 = vector.broadcast %14 : i32 to vector<1x256x1xi32>
    %16 = arith.remsi %12, %15 : vector<1x256x1xi32>
    %c0_i32_7 = arith.constant 0 : i32
    %17 = vector.broadcast %c0_i32_7 : i32 to vector<1x256x1xi32>
    %18 = arith.cmpi ne, %16, %17 : vector<1x256x1xi32>
    %c0_i32_8 = arith.constant 0 : i32
    %19 = vector.broadcast %c0_i32_8 : i32 to vector<1x256x1xi32>
    %20 = arith.cmpi slt, %16, %19 : vector<1x256x1xi32>
    %c0_i32_9 = arith.constant 0 : i32
    %21 = arith.cmpi slt, %14, %c0_i32_9 : i32
    %22 = vector.broadcast %21 : i1 to vector<1x256x1xi1>
    %23 = vector.broadcast %22 : vector<1x256x1xi1> to vector<1x256x1xi1>
    %24 = arith.xori %20, %23 : vector<1x256x1xi1>
    %25 = arith.andi %24, %18 : vector<1x256x1xi1>
    %26 = vector.broadcast %14 : i32 to vector<1x256x1xi32>
    %27 = arith.addi %16, %26 : vector<1x256x1xi32>
    %28 = arith.select %25, %27, %16 : vector<1x256x1xi1>, vector<1x256x1xi32>
    %c15_i32 = arith.constant 15 : i32
    %29 = vector.broadcast %c15_i32 : i32 to vector<1x256x1xi32>
    %30 = arith.cmpi eq, %28, %29 : vector<1x256x1xi32>
    %cst_10 = arith.constant 0.000000e+00 : f32
    %31 = vector.shape_cast %30 : vector<1x256x1xi1> to vector<1x256x1xi1>
    %32 = vector.broadcast %31 : vector<1x256x1xi1> to vector<1x256x4xi1>
    %33 = vector.broadcast %cst_10 : f32 to vector<1x256x4xf32>
    %34 = arith.select %32, %33, %11 : vector<1x256x4xi1>, vector<1x256x4xf32>
    %c0_i32_11 = arith.constant 0 : i32
    %35 = vector.broadcast %c0_i32_11 : i32 to vector<1x256x1xi32>
    %36 = arith.cmpi eq, %28, %35 : vector<1x256x1xi32>
    %cst_12 = arith.constant 0.000000e+00 : f32
    %37 = vector.shape_cast %36 : vector<1x256x1xi1> to vector<1x256x1xi1>
    %38 = vector.broadcast %37 : vector<1x256x1xi1> to vector<1x256x4xi1>
    %39 = vector.broadcast %cst_12 : f32 to vector<1x256x4xf32>
    %40 = arith.select %38, %39, %11 : vector<1x256x4xi1>, vector<1x256x4xf32>
    %cst_13 = arith.constant 0.000000e+00 : f32
    %41 = vector.broadcast %cst_13 : f32 to vector<1x17x4xf32>
    %42 = vector.extract_strided_slice %34 {offsets = [0, 0, 0], sizes = [1, 239, 4], strides = [1, 1, 1]} : vector<1x256x4xf32> to vector<1x239x4xf32>
    %43 = tpu.concatenate %41, %42 in 1 : vector<1x17x4xf32>, vector<1x239x4xf32> -> vector<1x256x4xf32>
    %44 = arith.truncf %43 : vector<1x256x4xf32> to vector<1x256x4xbf16>
    %cst_14 = arith.constant 0.000000e+00 : f32
    %45 = vector.broadcast %cst_14 : f32 to vector<1x16x4xf32>
    %46 = vector.extract_strided_slice %11 {offsets = [0, 0, 0], sizes = [1, 240, 4], strides = [1, 1, 1]} : vector<1x256x4xf32> to vector<1x240x4xf32>
    %47 = tpu.concatenate %45, %46 in 1 : vector<1x16x4xf32>, vector<1x240x4xf32> -> vector<1x256x4xf32>
    %48 = arith.truncf %47 : vector<1x256x4xf32> to vector<1x256x4xbf16>
    %cst_15 = arith.constant 0.000000e+00 : f32
    %49 = vector.broadcast %cst_15 : f32 to vector<1x15x4xf32>
    %50 = vector.extract_strided_slice %40 {offsets = [0, 0, 0], sizes = [1, 241, 4], strides = [1, 1, 1]} : vector<1x256x4xf32> to vector<1x241x4xf32>
    %51 = tpu.concatenate %49, %50 in 1 : vector<1x15x4xf32>, vector<1x241x4xf32> -> vector<1x256x4xf32>
    %52 = arith.truncf %51 : vector<1x256x4xf32> to vector<1x256x4xbf16>
    %53 = tpu.concatenate %44, %48, %52 in 2 : vector<1x256x4xbf16>, vector<1x256x4xbf16>, vector<1x256x4xbf16> -> vector<1x256x12xbf16>
    %54 = vector.shape_cast %53 : vector<1x256x12xbf16> to vector<256x12xbf16>
    %c0_16 = arith.constant 0 : index
    %c0_17 = arith.constant 0 : index
    %c0_18 = arith.constant 0 : index
    %55 = vector.load %arg3[%c0_16, %c0_17, %c0_18] : memref<3x12x4xbf16, #tpu.memory_space<vmem>>, vector<1x12x4xbf16>
    %56 = vector.shape_cast %55 : vector<1x12x4xbf16> to vector<12x4xbf16>
    %cst_19 = arith.constant dense<0.000000e+00> : vector<256x4xf32>
    %57 = tpu.matmul %54, %56, %cst_19 {dimension_numbers = #tpu.dot_dimension_numbers<[1], [0], [0], [1], [0, 0, 1, 1], [], []>} : vector<256x12xbf16>, vector<12x4xbf16>, vector<256x4xf32> -> vector<256x4xf32>
    %cst_20 = arith.constant 0.000000e+00 : f32
    %58 = vector.broadcast %cst_20 : f32 to vector<1x1x4xf32>
    %59 = vector.extract_strided_slice %34 {offsets = [0, 0, 0], sizes = [1, 255, 4], strides = [1, 1, 1]} : vector<1x256x4xf32> to vector<1x255x4xf32>
    %60 = tpu.concatenate %58, %59 in 1 : vector<1x1x4xf32>, vector<1x255x4xf32> -> vector<1x256x4xf32>
    %61 = arith.truncf %60 : vector<1x256x4xf32> to vector<1x256x4xbf16>
    %62 = arith.truncf %11 : vector<1x256x4xf32> to vector<1x256x4xbf16>
    %cst_21 = arith.constant 0.000000e+00 : f32
    %63 = vector.broadcast %cst_21 : f32 to vector<1x1x4xf32>
    %64 = vector.extract_strided_slice %40 {offsets = [0, 1, 0], sizes = [1, 255, 4], strides = [1, 1, 1]} : vector<1x256x4xf32> to vector<1x255x4xf32>
    %65 = tpu.concatenate %64, %63 in 1 : vector<1x255x4xf32>, vector<1x1x4xf32> -> vector<1x256x4xf32>
    %66 = arith.truncf %65 : vector<1x256x4xf32> to vector<1x256x4xbf16>
    %67 = tpu.concatenate %61, %62, %66 in 2 : vector<1x256x4xbf16>, vector<1x256x4xbf16>, vector<1x256x4xbf16> -> vector<1x256x12xbf16>
    %68 = vector.shape_cast %67 : vector<1x256x12xbf16> to vector<256x12xbf16>
    %c1 = arith.constant 1 : index
    %c0_22 = arith.constant 0 : index
    %c0_23 = arith.constant 0 : index
    %69 = vector.load %arg3[%c1, %c0_22, %c0_23] : memref<3x12x4xbf16, #tpu.memory_space<vmem>>, vector<1x12x4xbf16>
    %70 = vector.shape_cast %69 : vector<1x12x4xbf16> to vector<12x4xbf16>
    %cst_24 = arith.constant dense<0.000000e+00> : vector<256x4xf32>
    %71 = tpu.matmul %68, %70, %cst_24 {dimension_numbers = #tpu.dot_dimension_numbers<[1], [0], [0], [1], [0, 0, 1, 1], [], []>} : vector<256x12xbf16>, vector<12x4xbf16>, vector<256x4xf32> -> vector<256x4xf32>
    %72 = arith.addf %57, %71 : vector<256x4xf32>
    %cst_25 = arith.constant 0.000000e+00 : f32
    %73 = vector.broadcast %cst_25 : f32 to vector<1x15x4xf32>
    %74 = vector.extract_strided_slice %34 {offsets = [0, 15, 0], sizes = [1, 241, 4], strides = [1, 1, 1]} : vector<1x256x4xf32> to vector<1x241x4xf32>
    %75 = tpu.concatenate %74, %73 in 1 : vector<1x241x4xf32>, vector<1x15x4xf32> -> vector<1x256x4xf32>
    %76 = arith.truncf %75 : vector<1x256x4xf32> to vector<1x256x4xbf16>
    %cst_26 = arith.constant 0.000000e+00 : f32
    %77 = vector.broadcast %cst_26 : f32 to vector<1x16x4xf32>
    %78 = vector.extract_strided_slice %11 {offsets = [0, 16, 0], sizes = [1, 240, 4], strides = [1, 1, 1]} : vector<1x256x4xf32> to vector<1x240x4xf32>
    %79 = tpu.concatenate %78, %77 in 1 : vector<1x240x4xf32>, vector<1x16x4xf32> -> vector<1x256x4xf32>
    %80 = arith.truncf %79 : vector<1x256x4xf32> to vector<1x256x4xbf16>
    %cst_27 = arith.constant 0.000000e+00 : f32
    %81 = vector.broadcast %cst_27 : f32 to vector<1x17x4xf32>
    %82 = vector.extract_strided_slice %40 {offsets = [0, 17, 0], sizes = [1, 239, 4], strides = [1, 1, 1]} : vector<1x256x4xf32> to vector<1x239x4xf32>
    %83 = tpu.concatenate %82, %81 in 1 : vector<1x239x4xf32>, vector<1x17x4xf32> -> vector<1x256x4xf32>
    %84 = arith.truncf %83 : vector<1x256x4xf32> to vector<1x256x4xbf16>
    %85 = tpu.concatenate %76, %80, %84 in 2 : vector<1x256x4xbf16>, vector<1x256x4xbf16>, vector<1x256x4xbf16> -> vector<1x256x12xbf16>
    %86 = vector.shape_cast %85 : vector<1x256x12xbf16> to vector<256x12xbf16>
    %c2 = arith.constant 2 : index
    %c0_28 = arith.constant 0 : index
    %c0_29 = arith.constant 0 : index
    %87 = vector.load %arg3[%c2, %c0_28, %c0_29] : memref<3x12x4xbf16, #tpu.memory_space<vmem>>, vector<1x12x4xbf16>
    %88 = vector.shape_cast %87 : vector<1x12x4xbf16> to vector<12x4xbf16>
    %cst_30 = arith.constant dense<0.000000e+00> : vector<256x4xf32>
    %89 = tpu.matmul %86, %88, %cst_30 {dimension_numbers = #tpu.dot_dimension_numbers<[1], [0], [0], [1], [0, 0, 1, 1], [], []>} : vector<256x12xbf16>, vector<12x4xbf16>, vector<256x4xf32> -> vector<256x4xf32>
    %90 = arith.addf %72, %89 : vector<256x4xf32>
    %c0_31 = arith.constant 0 : index
    %c0_32 = arith.constant 0 : index
    %91 = vector.load %arg6[%c0_31, %c0_32] : memref<1x4xf32, #tpu.memory_space<vmem>>, vector<1x4xf32>
    %92 = vector.broadcast %91 : vector<1x4xf32> to vector<256x4xf32>
    %93 = arith.addf %90, %92 : vector<256x4xf32>
    %cst_33 = arith.constant 0.000000e+00 : f32
    %94 = vector.broadcast %cst_33 : f32 to vector<256x4xf32>
    %95 = arith.maximumf %93, %94 : vector<256x4xf32>
    %96 = arith.truncf %95 : vector<256x4xf32> to vector<256x4xbf16>
    %c0_34 = arith.constant 0 : index
    %c0_35 = arith.constant 0 : index
    %97 = vector.load %arg4[%c0_34, %c0_35] : memref<4x16xbf16, #tpu.memory_space<vmem>>, vector<4x16xbf16>
    %cst_36 = arith.constant dense<0.000000e+00> : vector<256x16xf32>
    %98 = tpu.matmul %96, %97, %cst_36 {dimension_numbers = #tpu.dot_dimension_numbers<[1], [0], [0], [1], [0, 0, 1, 1], [], []>} : vector<256x4xbf16>, vector<4x16xbf16>, vector<256x16xf32> -> vector<256x16xf32>
    %c0_37 = arith.constant 0 : index
    %c0_38 = arith.constant 0 : index
    %99 = vector.load %arg7[%c0_37, %c0_38] : memref<1x16xf32, #tpu.memory_space<vmem>>, vector<1x16xf32>
    %100 = vector.broadcast %99 : vector<1x16xf32> to vector<256x16xf32>
    %101 = arith.addf %98, %100 : vector<256x16xf32>
    %102 = tpu.transpose %101, [1, 0] : vector<256x16xf32> -> vector<16x256xf32>
    %c0_39 = arith.constant 0 : index
    %c0_40 = arith.constant 0 : index
    %c0_41 = arith.constant 0 : index
    %103 = vector.load %arg1[%c0_39, %c0_40, %c0_41] : memref<1x16x256xf32, #tpu.memory_space<vmem>>, vector<1x16x256xf32>
    %104 = vector.shape_cast %103 : vector<1x16x256xf32> to vector<16x256xf32>
    %105 = arith.addf %102, %104 : vector<16x256xf32>
    %cst_42 = arith.constant 0.000000e+00 : f32
    %106 = vector.broadcast %cst_42 : f32 to vector<16x256xf32>
    %107 = arith.maximumf %105, %106 : vector<16x256xf32>
    %c0_43 = arith.constant 0 : index
    %c0_44 = arith.constant 0 : index
    %c0_45 = arith.constant 0 : index
    %108 = vector.load %arg8[%c0_43, %c0_44, %c0_45] : memref<1x16x256xf32, #tpu.memory_space<vmem>>, vector<1x16x256xf32>
    %109 = vector.shape_cast %108 : vector<1x16x256xf32> to vector<16x256xf32>
    %110 = vector.shape_cast %107 : vector<16x256xf32> to vector<1x16x256xf32>
    tpu.vector_store %arg8[%c0_43, %c0_44, %c0_45], %110 {strides = array<i32>} : memref<1x16x256xf32, #tpu.memory_space<vmem>>, vector<1x16x256xf32>,
    return
  }
  func.func @transform_0(%arg0: i32) -> (i32, i32, i32) {
    %c0_i32 = arith.constant 0 : i32
    %c0_i32_0 = arith.constant 0 : i32
    %c0_i32_1 = arith.constant 0 : i32
    return %arg0, %c0_i32, %c0_i32_0 : i32, i32, i32
  }
  func.func @transform_1(%arg0: i32) -> (i32, i32) {
    %c0_i32 = arith.constant 0 : i32
    %c0_i32_0 = arith.constant 0 : i32
    %c0_i32_1 = arith.constant 0 : i32
    return %c0_i32, %c0_i32_0 : i32, i32
  }
  func.func @transform_2(%arg0: i32) -> (i32, i32, i32) {
    %c0_i32 = arith.constant 0 : i32
    %c0_i32_0 = arith.constant 0 : i32
    %c0_i32_1 = arith.constant 0 : i32
    %c0_i32_2 = arith.constant 0 : i32
    return %c0_i32, %c0_i32_0, %c0_i32_1 : i32, i32, i32
  }
  func.func @transform_3(%arg0: i32) -> (i32, i32) {
    %c0_i32 = arith.constant 0 : i32
    %c0_i32_0 = arith.constant 0 : i32
    %c0_i32_1 = arith.constant 0 : i32
    return %c0_i32, %c0_i32_0 : i32, i32
  }
  func.func @transform_4(%arg0: i32) -> (i32, i32) {
    %c0_i32 = arith.constant 0 : i32
    %c0_i32_0 = arith.constant 0 : i32
    %c0_i32_1 = arith.constant 0 : i32
    return %c0_i32, %c0_i32_0 : i32, i32
  }
  func.func @transform_5(%arg0: i32) -> (i32, i32) {
    %c0_i32 = arith.constant 0 : i32
    %c0_i32_0 = arith.constant 0 : i32
    %c0_i32_1 = arith.constant 0 : i32
    return %c0_i32, %c0_i32_0 : i32, i32
  }
  func.func @transform_6(%arg0: i32) -> (i32, i32) {
    %c0_i32 = arith.constant 0 : i32
    %c0_i32_0 = arith.constant 0 : i32
    %c0_i32_1 = arith.constant 0 : i32
    return %c0_i32, %c0_i32_0 : i32, i32
  }
  func.func @transform_7(%arg0: i32) -> (i32, i32, i32) {
    %c0_i32 = arith.constant 0 : i32
    %c0_i32_0 = arith.constant 0 : i32
    %c0_i32_1 = arith.constant 0 : i32
    return %arg0, %c0_i32, %c0_i32_0 : i32, i32, i32
  }
}

</mosaic_0001>

<bundles_post_ra>
// kernel: tpu_custom_call.1
= control target key start
LH: loop header
LB: loop body
LE: loop exit
PB: predicated region body
PF: predicated region fallthrough
CT: control target
= control target key end

     0   :  { %12 = vsyncpa [#allocation3], 0  ;;  %s4808_s0 = inlined_call_operand.hbm [shape: f32[2,16,256], index: 0, kind: input, shape index: {}]   ;;  %s4809_s1 = inlined_call_operand.vmem [shape: bf16[16,4], index: 1, kind: input, shape index: {}]   ;;  %s4810_s2 = inlined_call_operand.vmem [shape: bf16[3,12,4], index: 2, kind: input, shape index: {}]   ;;  %s4811_s3 = inlined_call_operand.vmem [shape: bf16[4,16], index: 3, kind: input, shape index: {}]   ;;  %s4812_s4 = inlined_call_operand.vmem [shape: f32[1,4], index: 4, kind: input, shape index: {}]   ;;  %s4813_s5 = inlined_call_operand.vmem [shape: f32[1,4], index: 5, kind: input, shape index: {}]   ;;  %s4814_s6 = inlined_call_operand.vmem [shape: f32[1,16], index: 6, kind: input, shape index: {}]   ;;  %s4815_s7 = inlined_call_operand.hbm [shape: f32[2,16,256], index: 7, kind: output, shape index: {}]  }
   0x1   :  { %14 = vsyncpa [#allocation3 + $0x1], 0 }
   0x2   :  { %15 = vsyncpa [#allocation4], 0 }
   0x3   :  { %17 = vsyncpa [#allocation4 + $0x1], 0  ;;  %s3519_s24 = smov 0   ;;  %s3521_s25 = smov 0  }
   0x4   :  { %s3523_s26 = smov 0   ;;  %s3525_s27 = smov 0  }
   0x5 LB: > { %s3540_s28 = sadd.s32 4294967295, %s3467_s27   ;;  %s2876_s29 = sadd.s32 4294967294, %s3467_s27   ;;  %s3467_s27 = sphi %s3525_s27, %s5018_s27   ;;  %s3463_s26 = sphi %s3523_s26, %s5017_s26   ;;  %s3459_s25 = sphi %s3521_s25, %s5016_s25   ;;  %s3455_s24 = sphi %s3519_s24, %s5015_s24  }
   0x6   : > { %s3544_s30 = sadd.s32 1, %s3467_s27   ;;  %s30_s8 = sadd.s32 1, %s3463_s26 }
   0x7   : > { %s27_s9 = ssub.s32 %s3467_s27, %s3544_s30  ;;  %p37_p0 = scmp.ne.s32.totalorder %s3463_s26, %s3459_s25 }
   0x8   : > { %p28_p1 = scmp.eq.s32.totalorder %s27_s9, 0  ;;  %p38_p2 = scmp.eq.s32.totalorder %s3467_s27, 0 }
   0x9   : > { %p43_p3 = scmp.ne.s32.totalorder %s3459_s25, %s3455_s24  ;;  %p44_p4 = scmp.eq.s32.totalorder %s3540_s28, 0 }
   0xa   : > { %s3556_s10 = scalar_select %p28_p1, %s3463_s26, %s30_s8  }
   0xb   : > { %p3558_p5 = por %p38_p2, %p37_p0  ;;  %p3562_p6 = por %p44_p4, %p43_p3 }
   0xc   : > { %p193_p7 = scmp.eq.s32.totalorder %s3540_s28, 1  ;;  %p199_p8 = scmp.eq.s32.totalorder %s2876_s29, 1 }
   0xd   : > { %p3321_p10 = scmp.lt.s32.totalorder %s3467_s27, 2  ;;  %s237_s15 = sand.u32 1, %s3463_s26  }
   0xe   : > { %p3569_p11 = por %p193_p7, %p37_p0  ;;  %p3573_p12 = por %p199_p8, %p43_p3 }
   0xf   : > { %s2981_s16 = sshll.u32 %s3467_s27, 9  ;;  %s2879_s17 = sshll.u32 %s237_s15, 5 }
  0x10   : > { %s4847_s13 = scalar_select %p3569_p11, 1, 0 }
  0x11   : > { %s4848_s14 = scalar_select %p3573_p12, 1, 0 }
  0x12   : > { %s3582_s20 = scalar_lea.hbm %s4808_s0, %s2981_s16  ;;  %s241_s21 = scalar_lea.vmem [#allocation2], %s2879_s17 }
  0x13   : > { %s248_s22 = sshll.u32 %s241_s21, 4  ;;  %p3586_p13 = pnand %p3321_p10, %p3558_p5  ;;  %s3590_s22 = int_to_ptr.vmem [resolvable:$true] %s248_s22 }
  0x14   : > { %s3592_s29 = scalar_lea.sflag [#allocation3], %s237_s15  ;;  %s3371_s8 = scalar_lea.hbm %s3582_s20, 512 }
  0x15   : > { %p3372_p0 = scmp.ne.s32.totalorder %s3582_s20, %s3371_s8  ;;  %p3373_p1 = pneg %p3586_p13 }
  0x16   : > { %s3376_s16 = scalar_lea.hbm %s4808_s0, 1024  ;;  %p3377_p4 = scmp.lt.u32.totalorder %s3582_s20, %s4808_s0 }
  0x17   : > { %p3374_p2 = pnand %p3373_p1, %p3372_p0  ;;  %p3378_p5 = scmp.lt.u32.totalorder %s3376_s16, %s3371_s8 }
  0x18   : > { %p3380_p8 = scmp.lt.u32.totalorder %s3371_s8, %s3582_s20 }
  0x19   : > { %p3375_p3 = pneg %p3374_p2  ;;  %p3379_p7 = por %p3378_p5, %p3377_p4 }
  0x1b   : > { %p3381_p10 = por %p3380_p8, %p3379_p7 }
  0x1d   : > { %p3382_p9 = pnand %p3381_p10, %p3375_p3 }
  0x1f   : > { %3385 = shalt.err (!%p3382_p9)
}
  0x20   : > { %s3386_s15 = scalar_lea.vmem %s3590_s22, 512  ;;  %s3469_s19 = smov [#allocation2]  }
  0x21   : > { %p3387_p0 = scmp.ne.s32.totalorder %s3590_s22, %s3386_s15  ;;  %s3391_s21 = sshll.u32 %s3469_s19, 4  ;;  %s3392_s21 = int_to_ptr.vmem [resolvable:$false] %s3391_s21 }
  0x22   : > { %s3393_s9 = scalar_lea.vmem %s3392_s21, 1024  ;;  %p3394_p11 = scmp.lt.s32.totalorder %s3590_s22, %s3392_s21 }
  0x23   : > { %p3389_p2 = pnand %p3387_p0, %p3373_p1  ;;  %p3395_p4 = scmp.lt.s32.totalorder %s3393_s9, %s3386_s15 }
  0x25   : > { %p3390_p12 = pneg %p3389_p2  ;;  %p3396_p5 = por %p3395_p4, %p3394_p11 }
  0x27   : > { %p3397_p7 = pnand %p3396_p5, %p3390_p12 }
  0x29   : > { %3400 = shalt.err (!%p3397_p7)
}
  0x2a   : > { %s3470_s8 = smov 256   ;;  %s3471_s11 = smov 16  }
  0x2b   : > { %3316 = dma.hbm_to_vmem [thread:$0]  (!%p3586_p13), %s3582_s20, 512, %s3590_s22, %s3592_s29, %s3470_s8, %s3470_s8, %s3471_s11  }
  0x2c   : > { %p2882_p9 = scmp.ge.s32.totalorder %s3467_s27, 1  ;;  %p256_p1 = scmp.lt.s32.totalorder %s3467_s27, 3 }
  0x2e   : > { %p257_p3 = pnand %p2882_p9, %p256_p1 }
  0x30   : > { %260 = sbr.rel (%p257_p3) target bundleno = 1328 (0x530), region = 48 }
  0x37   : > { %s3623_s16 = sand.u32 1, %s3459_s25  }
  0x38   : > { %s2883_s17 = sshll.u32 %s3623_s16, 5  ;;  %s263_s18 = scalar_lea.sflag [#allocation3], %s3623_s16 }
  0x39   : > { %s3629_s15 = scalar_lea.vmem [#allocation2], %s2883_s17 }
  0x3a   : > { %3446 = dma.done.wait (%p3562_p6), %s263_s18, 512  }
  0x3b   : > { %3448 = vsyncadd (%p3562_p6), %s263_s18, 4294966784  ;;  %v298_v0 = vld [vmem:[%s3629_s15] sm:$0xff]  ;;  %v300_v1 = vld [vmem:[%s3629_s15 + $0x10] sm:$0xff]  ;;  %vm397_vm0 = vcmask 130048   ;;  %v639_v53 = vlaneseq  ;;  %vm1495_vm5 = vcmask 1046528   ;;  %vm1342_vm6 = vcmask 1040384  }
  0x3c   : > { %v299_v2 = vld [vmem:[%s3629_s15 + $0x8] sm:$0xff]  ;;  %302 = vxpose.xlu0.b32.start [1/2] (short) %v298_v0, 128  ;;  %v301_v3 = vld [vmem:[%s3629_s15 + $0x18] sm:$0xff]  ;;  %v3363_v4 = vld [vmem:[%s4809_s1] sm:$0xff]   ;;  %s3472_s21 = smov 4   ;;  %s3473_s9 = smov 8  }
  0x3d   : > { %334 = vxpose.xlu1.b32.start [1/2] (short) %v299_v2, 128  ;;  %3068 = vmatprep.subr.bf16.mxu0 %v3363_v4  ;;  %v3658_v54 = vshrl.u32 %v639_v53, 7  ;;  %v3666_v58 = vld [vmem:[%s4812_s4] ss:$0 sm:$0xff]  ;;  %s2982_s11 = sshll.u32 %s3540_s28, 9  ;;  %s2790_s22 = scalar_lea.sflag [#allocation4], %s3623_s16 }
  0x3e   : > { %3069 = vmatpush3.bf16.msra.mxu0 %v3363_v4  ;;  %s4764_s20 = scalar_lea.hbm %s4815_s7, %s2982_s11  ;;  %p5012_p11 = scmp.ne.s32.totalorder %s4847_s13, 0 }
  0x3f   : > { %v642_v55 = vadd.s32 16, %v3658_v54  ;;  %v643_v56 = vadd.s32 24, %v3658_v54  ;;  %v641_v57 = vadd.s32 8, %v3658_v54  ;;  %v676_v60 = vand.u32 15, %v3658_v54  ;;  %s3476_s28 = smov [#allocation5]  }
  0x40   : > { %303 = vxpose.xlu0.b32.end [2/2] (short) %v300_v1, 128  ;;  %s3405_s23 = sshll.u32 %s3476_s28, 4  ;;  %s3406_s23 = int_to_ptr.vmem [resolvable:$false] %s3405_s23 }
  0x41   : > { %335 = vxpose.xlu1.b32.end [2/2] (short) %v301_v3, 128  ;;  %v690_v59 = vand.u32 15, %v642_v55  ;;  %v697_v61 = vand.u32 15, %v643_v56  ;;  %v683_v62 = vand.u32 15, %v641_v57  ;;  %vm3675_vm2 = vcmp.eq.s32.totalorder %v676_v60, 0  ;;  %s3407_s29 = scalar_lea.vmem %s3406_s23, 1024 }
  0x43   : > { %vm3670_vm1 = vcmp.eq.s32.totalorder %v690_v59, 0  ;;  %vm3682_vm3 = vcmp.eq.s32.totalorder %v697_v61, 15  ;;  %vm3686_vm4 = vcmp.eq.s32.totalorder %v683_v62, 15  ;;  %v650_v61 = vadd.s32 80, %v3658_v54 }
  0xbc   : > { %v318_v5 = vpop.trf.xlu0 }
  0xbd   : > { %v350_v6 = vpop.trf.xlu1 }
  0xc0   : > { %v319_v7 = vpop.trf.xlu0 }
  0xc1   : > { %v366_v8 = vpack.c.bf16 %v319_v7, %v318_v5  ;;  %v351_v9 = vpop.trf.xlu1 }
  0xc2   : > { %v374_v40 = vpack.c.bf16 %v351_v9, %v350_v6 }
  0xc3   : > { %3070 = vmatprep.mubr.msk.bf16.mxu0 %vm397_vm0, %v366_v8 }
  0xc4   : > { %v320_v10 = vpop.trf.xlu0 }
  0xc5   : > { %v352_v12 = vpop.trf.xlu1 }
  0xc8   : > { %v321_v11 = vpop.trf.xlu0 }
  0xc9   : > { %v367_v13 = vpack.c.bf16 %v321_v11, %v320_v10  ;;  %v353_v15 = vpop.trf.xlu1 }
  0xca   : > { %v375_v42 = vpack.c.bf16 %v353_v15, %v352_v12 }
  0xcb   : > { %3071 = vmatmul.mubr.msk.bf16.vlgmr.msra.gmra.mrb[0].mxu0 %vm397_vm0, %v367_v13 }
  0xcc   : > { %v322_v14 = vpop.trf.xlu0 }
  0xcd   : > { %v354_v19 = vpop.trf.xlu1 }
  0xd0   : > { %v323_v16 = vpop.trf.xlu0 }
  0xd1   : > { %v368_v17 = vpack.c.bf16 %v323_v16, %v322_v14  ;;  %v355_v22 = vpop.trf.xlu1  ;;  %v646_v16 = vadd.s32 48, %v3658_v54 }
  0xd2   : > { %v376_v43 = vpack.c.bf16 %v355_v22, %v354_v19 }
  0xd3   : > { %3074 = vmatprep.mubr.msk.bf16.mxu0 %vm397_vm0, %v368_v17 }
  0xd4   : > { %v324_v18 = vpop.trf.xlu0 }
  0xd5   : > { %v356_v25 = vpop.trf.xlu1 }
  0xd8   : > { %v325_v20 = vpop.trf.xlu0 }
  0xd9   : > { %v369_v21 = vpack.c.bf16 %v325_v20, %v324_v18  ;;  %v357_v28 = vpop.trf.xlu1 }
  0xda   : > { %v377_v45 = vpack.c.bf16 %v357_v28, %v356_v25  ;;  %v3964_v28 = vadd.s32 200, %v3658_v54 }
  0xdb   : > { %3075 = vmatmul.mubr.msk.bf16.gmra.mrb[4].mxu0 %vm397_vm0, %v369_v21 }
  0xdc   : > { %v326_v23 = vpop.trf.xlu0 }
  0xdd   : > { %v358_v32 = vpop.trf.xlu1 }
  0xe0   : > { %v327_v24 = vpop.trf.xlu0 }
  0xe1   : > { %v370_v26 = vpack.c.bf16 %v327_v24, %v326_v23  ;;  %v359_v35 = vpop.trf.xlu1  ;;  %v3960_v24 = vadd.s32 216, %v3658_v54 }
  0xe2   : > { %v378_v46 = vpack.c.bf16 %v359_v35, %v358_v32 }
  0xe3   : > { %3078 = vmatprep.mubr.msk.bf16.mxu0 %vm397_vm0, %v370_v26 }
  0xe4   : > { %v328_v27 = vpop.trf.xlu0 }
  0xe5   : > { %v360_v38 = vpop.trf.xlu1 }
  0xe8   : > { %v329_v29 = vpop.trf.xlu0 }
  0xe9   : > { %v371_v30 = vpack.c.bf16 %v329_v29, %v328_v27  ;;  %v361_v41 = vpop.trf.xlu1 }
  0xea   : > { %v379_v49 = vpack.c.bf16 %v361_v41, %v360_v38 }
  0xeb   : > { %3079 = vmatmul.mubr.msk.bf16.gmra.mrb[8].mxu0 %vm397_vm0, %v371_v30  ;;  %v644_v30 = vadd.s32 32, %v3658_v54 }
  0xec   : > { %v330_v31 = vpop.trf.xlu0 }
  0xed   : > { %v362_v44 = vpop.trf.xlu1 }
  0xf0   : > { %v331_v33 = vpop.trf.xlu0 }
  0xf1   : > { %v372_v34 = vpack.c.bf16 %v331_v33, %v330_v31  ;;  %v363_v47 = vpop.trf.xlu1  ;;  %v647_v31 = vadd.s32 56, %v3658_v54  ;;  %v645_v33 = vadd.s32 40, %v3658_v54 }
  0xf2   : > { %v380_v50 = vpack.c.bf16 %v363_v47, %v362_v44  ;;  %v704_v44 = vand.u32 15, %v644_v30 }
  0xf3   : > { %3082 = vmatprep.mubr.msk.bf16.mxu0 %vm397_vm0, %v372_v34 }
  0xf4   : > { %v332_v36 = vpop.trf.xlu0  ;;  %vm3757_vm8 = vcmp.eq.s32.totalorder %v704_v44, 0 }
  0xf5   : > { %v364_v48 = vpop.trf.xlu1 }
  0xf8   : > { %v333_v37 = vpop.trf.xlu0 }
  0xf9   : > { %v373_v39 = vpack.c.bf16 %v333_v37, %v332_v36  ;;  %v365_v51 = vpop.trf.xlu1 }
  0xfa   : > { %v381_v52 = vpack.c.bf16 %v365_v51, %v364_v48 }
  0xfb   : > { %3083 = vmatmul.mubr.msk.bf16.gmra.mrb[12].mxu0 %vm397_vm0, %v373_v39 }
  0xfc   : > { %3086 = vmatprep.mubr.msk.bf16.mxu0 %vm397_vm0, %v374_v40 }
 0x103   : > { %3087 = vmatmul.mubr.msk.bf16.gmra.mrb[16].mxu0 %vm397_vm0, %v375_v42  ;;  %v3943_v42 = vadd.s32 184, %v3658_v54 }
 0x104   : > { %3090 = vmatprep.mubr.msk.bf16.mxu0 %vm397_vm0, %v376_v43  ;;  %v718_v43 = vand.u32 15, %v646_v16  ;;  %v3954_v16 = vadd.s32 208, %v3658_v54 }
 0x106   : > { %vm3752_vm7 = vcmp.eq.s32.totalorder %v718_v43, 0 }
 0x10b   : > { %3091 = vmatmul.mubr.msk.bf16.gmra.mrb[20].mxu0 %vm397_vm0, %v377_v45  ;;  %v725_v45 = vand.u32 15, %v647_v31 }
 0x10c   : > { %3094 = vmatprep.mubr.msk.bf16.mxu0 %vm397_vm0, %v378_v46  ;;  %v711_v46 = vand.u32 15, %v645_v33 }
 0x10d   : > { %vm3761_vm9 = vcmp.eq.s32.totalorder %v725_v45, 15 }
 0x10e   : > { %vm3768_vm10 = vcmp.eq.s32.totalorder %v711_v46, 15  ;;  %v3946_v46 = vadd.s32 168, %v3658_v54 }
 0x113   : > { %3095 = vmatmul.mubr.msk.bf16.gmra.mrb[24].mxu0 %vm397_vm0, %v379_v49 }
 0x114   : > { %3098 = vmatprep.mubr.msk.bf16.mxu0 %vm397_vm0, %v380_v50 }
 0x11b   : > { %3099 = vmatmul.mubr.msk.bf16.gmra.mrb[28].mxu0 %vm397_vm0, %v381_v52  ;;  %v654_v52 = vadd.s32 112, %v3658_v54 }
 0x19e   : > { %v3072_v63 = vpop.f32.mrb[0].mxu0 }
 0x19f   : > { %v489_v0 = vadd.f32 %v3072_v63, %v3666_v58  ;;  %v480_v1 = vpop.f32.mrb[1].mxu0 }
 0x1a0   : > { %v481_v3 = vadd.f32 %v3666_v58, %v480_v1  ;;  %v3073_v5 = vpop.f32.mrb[2].mxu0  ;;  %v651_v1 = vadd.s32 88, %v3658_v54 }
 0x1a1   : > { %v3679_v6 = vmax.f32 %v489_v0, 0.0  ;;  %v492_v7 = vadd.f32 %v3073_v5, %v3666_v58  ;;  %v483_v9 = vpop.f32.mrb[3].mxu0  ;;  %v648_v0 = vadd.s32 64, %v3658_v54  ;;  %v649_v5 = vadd.s32 72, %v3658_v54 }
 0x1a2   : > { %v3690_v11 = vmax.f32 %v481_v3, 0.0  ;;  %v484_v12 = vadd.f32 %v3666_v58, %v483_v9  ;;  %v753_v50 = vand.u32 15, %v651_v1 }
 0x1a3   : > { %v1282_v13 = vsel %vm3670_vm1, 0.0, %v3679_v6  ;;  %v1346_v14 = vrot.slane %v3679_v6, 7  ;;  %v3697_v15 = vmax.f32 %v492_v7, 0.0 }
 0x1a4   : > { %v1499_v17 = vrot.slane %v1282_v13, 1  ;;  %v1280_v18 = vsel %vm3675_vm2, 0.0, %v3690_v11  ;;  %v1343_v19 = vrot.slane %v3690_v11, 7  ;;  %v3704_v20 = vmax.f32 %v484_v12, 0.0 }
 0x1a5   : > { %v3706_v21 = vrot.slane %v1280_v18, 1  ;;  %v1155_v22 = vsel %vm3682_vm3, 0.0, %v3697_v15  ;;  %v1501_v23 = vrot.slane %v3697_v15, 1  ;;  %vm3848_vm13 = vcmp.eq.s32.totalorder %v753_v50, 15 }
 0x1a6   : > { %v1348_v25 = vrot.slane %v1155_v22, 7  ;;  %v1153_v26 = vsel %vm3686_vm4, 0.0, %v3704_v20  ;;  %v1497_v27 = vrot.slane %v3704_v20, 1  ;;  %v3742_v39 = vsel %vm1342_vm6, 0.0, %v1343_v19 }
 0x1a7   : > { %v1344_v29 = vrot.slane %v1153_v26, 7  ;;  %v3723_v32 = vsel %vm1495_vm5, %v1499_v17, %v1501_v23  ;;  %4860 = vst [vmem:[#allocation10_spill] sm:$0xff] %v3742_v39 }
 0x1a8   : > { %v3728_v34 = vsel %vm1495_vm5, %v3706_v21, %v1497_v27  ;;  %v3731_v35 = vsel %vm1495_vm5, %v1497_v27, %v1499_v17  ;;  %v3734_v36 = vsel %vm1342_vm6, %v1346_v14, %v1348_v25 }
 0x1a9   : > { %4858 = vst [vmem:[#allocation8_spill] sm:$0xff] %v3734_v36  ;;  %v3739_v38 = vsel %vm1342_vm6, %v1343_v19, %v1344_v29  ;;  %v3745_v40 = vsel %vm1342_vm6, %v1344_v29, %v1346_v14 }
 0x1aa   : > { %4859 = vst [vmem:[#allocation9_spill] sm:$0xff] %v3739_v38  ;;  %4861 = vst [vmem:[#allocation11_spill] sm:$0xff] %v3745_v40 }
 0x1ae   : > { %v3076_v47 = vpop.f32.mrb[4].mxu0 }
 0x1af   : > { %v505_v48 = vadd.f32 %v3076_v47, %v3666_v58  ;;  %v496_v49 = vpop.f32.mrb[5].mxu0  ;;  %v656_v47 = vadd.s32 128, %v3658_v54 }
 0x1b0   : > { %v497_v51 = vadd.f32 %v3666_v58, %v496_v49  ;;  %v3077_v53 = vpop.f32.mrb[6].mxu0  ;;  %v732_v49 = vand.u32 15, %v648_v0 }
 0x1b1   : > { %v3765_v56 = vmax.f32 %v505_v48, 0.0  ;;  %v508_v57 = vadd.f32 %v3077_v53, %v3666_v58  ;;  %v499_v59 = vpop.f32.mrb[7].mxu0  ;;  %v746_v48 = vand.u32 15, %v650_v61  ;;  %v652_v53 = vadd.s32 96, %v3658_v54 }
 0x1b2   : > { %v3773_v62 = vmax.f32 %v497_v51, 0.0  ;;  %v500_v63 = vadd.f32 %v3666_v58, %v499_v59  ;;  %v739_v51 = vand.u32 15, %v649_v5  ;;  %vm3844_vm12 = vcmp.eq.s32.totalorder %v732_v49, 0 }
 0x1b3   : > { %v1286_v2 = vsel %vm3752_vm7, 0.0, %v3765_v56  ;;  %v1354_v3 = vrot.slane %v3765_v56, 7  ;;  %v3782_v4 = vmax.f32 %v508_v57, 0.0  ;;  %v655_v57 = vadd.s32 120, %v3658_v54 }
 0x1b4   : > { %v1507_v7 = vrot.slane %v1286_v2, 1  ;;  %v1284_v8 = vsel %vm3757_vm8, 0.0, %v3773_v62  ;;  %v1350_v9 = vrot.slane %v3773_v62, 7  ;;  %v3789_v10 = vmax.f32 %v500_v63, 0.0 }
 0x1b5   : > { %v1503_v12 = vrot.slane %v1284_v8, 1  ;;  %v1159_v13 = vsel %vm3761_vm9, 0.0, %v3782_v4  ;;  %v1509_v14 = vrot.slane %v3782_v4, 1  ;;  %vm3839_vm11 = vcmp.eq.s32.totalorder %v746_v48, 0 }
 0x1b6   : > { %v1356_v17 = vrot.slane %v1159_v13, 7  ;;  %v1157_v18 = vsel %vm3768_vm10, 0.0, %v3789_v10  ;;  %v1505_v19 = vrot.slane %v3789_v10, 1  ;;  %v3810_v30 = vsel %vm1342_vm6, %v1348_v25, %v1350_v9 }
 0x1b7   : > { %v1352_v26 = vrot.slane %v1157_v18, 7  ;;  %v3804_v27 = vsel %vm1495_vm5, %v1501_v23, %v1503_v12  ;;  %v3807_v29 = vsel %vm1495_vm5, %v1507_v7, %v1509_v14  ;;  %4871 = vst [vmem:[#allocation13_spill] sm:$0xff] %v3810_v30  ;;  %vm3852_vm14 = vcmp.eq.s32.totalorder %v739_v51, 15 }
 0x1b8   : > { %4870 = vst [vmem:[#allocation12_spill] sm:$0xff] %v3807_v29  ;;  %v3813_v31 = vsel %vm1495_vm5, %v1503_v12, %v1505_v19  ;;  %v3816_v33 = vsel %vm1495_vm5, %v1505_v19, %v1507_v7  ;;  %v3821_v44 = vsel %vm1342_vm6, %v1354_v3, %v1356_v17  ;;  %v760_v12 = vand.u32 15, %v652_v53 }
 0x1b9   : > { %4872 = vst [vmem:[#allocation14_spill] sm:$0xff] %v3821_v44  ;;  %v3826_v45 = vsel %vm1342_vm6, %v1350_v9, %v1352_v26  ;;  %v3829_v25 = vsel %vm1342_vm6, %v1352_v26, %v1354_v3  ;;  %v774_v9 = vand.u32 15, %v654_v52  ;;  %v781_v19 = vand.u32 15, %v655_v57 }
 0x1ba   : > { %4873 = vst [vmem:[#allocation15_spill] sm:$0xff] %v3826_v45  ;;  %4874 = vst [vmem:[#allocation16_spill] sm:$0xff] %v3829_v25  ;;  %v3863_v26 = vadd.s32 104, %v3658_v54  ;;  %v658_v51 = vadd.s32 144, %v3658_v54  ;;  %vm3934_vm0 = vcmp.eq.s32.totalorder %v760_v12, 0  ;;  %v788_v41 = vand.u32 15, %v656_v47 }
 0x1bb   : > { %vm3930_vm15 = vcmp.eq.s32.totalorder %v774_v9, 0  ;;  %vm3948_vm1 = vcmp.eq.s32.totalorder %v781_v19, 15  ;;  %v3957_v23 = vadd.s32 192, %v3658_v54  ;;  %v3967_v47 = vadd.s32 240, %v3658_v54 }
 0x1bc   : > { %vm3980_vm3 = vcmp.eq.s32.totalorder %v788_v41, 0 }
 0x1be   : > { %v3080_v55 = vpop.f32.mrb[8].mxu0 }
 0x1bf   : > { %v521_v59 = vadd.f32 %v3080_v55, %v3666_v58  ;;  %v512_v63 = vpop.f32.mrb[9].mxu0 }
 0x1c0   : > { %v513_v2 = vadd.f32 %v3666_v58, %v512_v63  ;;  %v3081_v0 = vpop.f32.mrb[10].mxu0 }
 0x1c1   : > { %v3856_v5 = vmax.f32 %v521_v59, 0.0  ;;  %v524_v7 = vadd.f32 %v3081_v0, %v3666_v58  ;;  %v515_v8 = vpop.f32.mrb[11].mxu0 }
 0x1c2   : > { %v3859_v13 = vmax.f32 %v513_v2, 0.0  ;;  %v516_v18 = vadd.f32 %v3666_v58, %v515_v8  ;;  %v4014_v2 = vadd.s32 248, %v3658_v54 }
 0x1c3   : > { %4883 = vst [vmem:[#allocation17_spill] sm:$0xff] %v3856_v5  ;;  %v1290_v48 = vsel %vm3839_vm11, 0.0, %v3856_v5  ;;  %v1362_v49 = vrot.slane %v3856_v5, 7  ;;  %v3869_v50 = vmax.f32 %v524_v7, 0.0  ;;  %vm1854_vm11 = vcmask 1045504  }
 0x1c4   : > { %v1515_v52 = vrot.slane %v1290_v48, 1  ;;  %v1288_v53 = vsel %vm3844_vm12, 0.0, %v3859_v13  ;;  %v1358_v55 = vrot.slane %v3859_v13, 7  ;;  %v3876_v57 = vmax.f32 %v516_v18, 0.0 }
 0x1c5   : > { %4884 = vst [vmem:[#allocation18_spill] sm:$0xff] %v3869_v50  ;;  %v1511_v59 = vrot.slane %v1288_v53, 1  ;;  %v1163_v60 = vsel %vm3848_vm13, 0.0, %v3869_v50  ;;  %v4817_v63 = vrot.slane %v3869_v50, 1 }
 0x1c6   : > { %v3884_v0 = vrot.slane %v1163_v60, 7  ;;  %v1161_v61 = vsel %vm3852_vm14, 0.0, %v3876_v57  ;;  %v1513_v7 = vrot.slane %v3876_v57, 1  ;;  %v3901_v53 = vsel %vm1342_vm6, %v1356_v17, %v1358_v55 }
 0x1c7   : > { %v1360_v18 = vrot.slane %v1161_v61, 7  ;;  %v3893_v1 = vsel %vm1495_vm5, %v1509_v14, %v1511_v59  ;;  %v3898_v48 = vsel %vm1495_vm5, %v1515_v52, %v4817_v63  ;;  %4887 = vst [vmem:[#allocation21_spill] sm:$0xff] %v3901_v53  ;;  %v3940_v61 = vadd.s32 160, %v3658_v54 }
 0x1c8   : > { %4885 = vst [vmem:[#allocation19_spill] sm:$0xff] %v3893_v1  ;;  %4886 = vst [vmem:[#allocation20_spill] sm:$0xff] %v3898_v48  ;;  %v3904_v3 = vsel %vm1495_vm5, %v1511_v59, %v1513_v7  ;;  %v3907_v60 = vsel %vm1495_vm5, %v1513_v7, %v1515_v52  ;;  %v3913_v14 = vsel %vm1342_vm6, %v1362_v49, %v3884_v0  ;;  %v659_v52 = vadd.s32 152, %v3658_v54 }
 0x1c9   : > { %4888 = vst [vmem:[#allocation22_spill] sm:$0xff] %v3913_v14  ;;  %v3919_v17 = vsel %vm1342_vm6, %v1358_v55, %v1360_v18  ;;  %v3922_v59 = vsel %vm1342_vm6, %v1360_v18, %v1362_v49  ;;  %v657_v7 = vadd.s32 136, %v3658_v54  ;;  %v662_v49 = vadd.s32 176, %v3658_v54 }
 0x1ca   : > { %4889 = vst [vmem:[#allocation23_spill] sm:$0xff] %v3919_v17  ;;  %4890 = vst [vmem:[#allocation24_spill] sm:$0xff] %v3922_v59  ;;  %v802_v18 = vand.u32 15, %v658_v51  ;;  %v809_v8 = vand.u32 15, %v659_v52  ;;  %v816_v63 = vand.u32 15, %v3940_v61  ;;  %v837_v59 = vand.u32 15, %v3943_v42 }
 0x1cb   : > { %v795_v43 = vand.u32 15, %v657_v7  ;;  %v830_v37 = vand.u32 15, %v662_v49  ;;  %v4023_v55 = vadd.s32 232, %v3658_v54 }
 0x1cc   : > { %vm3970_vm2 = vcmp.eq.s32.totalorder %v802_v18, 0  ;;  %v3986_v18 = vadd.s32 224, %v3658_v54  ;;  %vm3991_vm4 = vcmp.eq.s32.totalorder %v809_v8, 15  ;;  %vm4053_vm9 = vcmp.eq.s32.totalorder %v816_v63, 0 }
 0x1cd   : > { %vm4002_vm7 = vcmp.eq.s32.totalorder %v795_v43, 15  ;;  %vm4040_vm8 = vcmp.eq.s32.totalorder %v830_v37, 0  ;;  %vm4065_vm10 = vcmp.eq.s32.totalorder %v837_v59, 15 }
 0x1ce   : > { %v3084_v51 = vpop.f32.mrb[12].mxu0  ;;  %v4943_v1 = vand.u32 15, %v3986_v18 }
 0x1cf   : > { %v537_v19 = vadd.f32 %v3084_v51, %v3666_v58  ;;  %v528_v22 = vpop.f32.mrb[13].mxu0  ;;  %v823_v51 = vand.u32 15, %v3946_v46 }
 0x1d0   : > { %v529_v12 = vadd.f32 %v3666_v58, %v528_v22  ;;  %v3085_v52 = vpop.f32.mrb[14].mxu0  ;;  %v4921_v22 = vand.u32 15, %v3863_v26 }
 0x1d1   : > { %v3977_v49 = vmax.f32 %v537_v19, 0.0  ;;  %v540_v14 = vadd.f32 %v3085_v52, %v3666_v58  ;;  %v531_v25 = vpop.f32.mrb[15].mxu0  ;;  %vm4078_vm12 = vcmp.eq.s32.totalorder %v823_v51, 15 }
 0x1d2   : > { %v3988_v53 = vmax.f32 %v529_v12, 0.0  ;;  %v532_v42 = vadd.f32 %v3666_v58, %v531_v25  ;;  %v4906_v25 = vrot.slane %v3869_v50, 1  ;;  %vm4116_vm13 = vcmp.eq.s32.totalorder %v4921_v22, 15 }
 0x1d3   : > { %v1294_v19 = vsel %vm3930_vm15, 0.0, %v3977_v49  ;;  %v4000_v52 = vmax.f32 %v540_v14, 0.0 }
 0x1d4   : > { %v1523_v12 = vrot.slane %v1294_v19, 1  ;;  %v1292_v61 = vsel %vm3934_vm0, 0.0, %v3988_v53  ;;  %v4011_v41 = vmax.f32 %v532_v42, 0.0  ;;  %v4919_v59 = vrot.slane %v3988_v53, 7 }
 0x1d5   : > { %4903 = vst [vmem:[#allocation25_spill] sm:$0xff] %v4000_v52  ;;  %v1519_v14 = vrot.slane %v1292_v61, 1  ;;  %v1525_v43 = vrot.slane %v4000_v52, 1  ;;  %v1167_v61 = vsel %vm3948_vm1, 0.0, %v4000_v52 }
 0x1d6   : > { %v1521_v19 = vrot.slane %v4011_v41, 1  ;;  %v3088_v40 = vpop.f32.mrb[16].mxu0  ;;  %v4060_v5 = vrot.slane %v1167_v61, 7 }
 0x1d7   : > { %v553_v17 = vadd.f32 %v3088_v40, %v3666_v58  ;;  %v544_v36 = vpop.f32.mrb[17].mxu0  ;;  %v4034_v8 = vsel %vm1495_vm5, %v4906_v25, %v1519_v14  ;;  %v4037_v30 = vsel %vm1495_vm5, %v1523_v12, %v1525_v43 }
 0x1d8   : > { %4907 = vst [vmem:[#allocation26_spill] sm:$0xff] %v4034_v8  ;;  %4908 = vst [vmem:[#allocation27_spill] sm:$0xff] %v4037_v30  ;;  %v545_v54 = vadd.f32 %v3666_v58, %v544_v36  ;;  %v3089_v45 = vpop.f32.mrb[18].mxu0  ;;  %v4045_v9 = vsel %vm1495_vm5, %v1519_v14, %v1521_v19  ;;  %v4048_v40 = vsel %vm1495_vm5, %v1521_v19, %v1523_v12  ;;  %v4940_v30 = vand.u32 15, %v3967_v47 }
 0x1d9   : > { %4911 = vst [vmem:[#allocation28_spill] sm:$0xff] %v4045_v9  ;;  %4912 = vst [vmem:[#allocation29_spill] sm:$0xff] %v4048_v40  ;;  %v625_v39 = vmax.f32 %v553_v17, 0.0  ;;  %v556_v38 = vadd.f32 %v3089_v45, %v3666_v58  ;;  %v547_v52 = vpop.f32.mrb[19].mxu0  ;;  %v4072_v45 = vld [vmem:[%s4810_s2 + $0x8] sm:$0x3f]  }
 0x1da   : > { %v4062_v12 = vmax.f32 %v545_v54, 0.0  ;;  %v548_v19 = vadd.f32 %v3666_v58, %v547_v52  ;;  %v4086_v52 = vsel %vm1342_vm6, %v3884_v0, %v4919_v59  ;;  %3305 = vmatprep.subr.msk.bf16.mxu1 %vm1854_vm11, %v4072_v45  ;;  %3304 = vmatprep.subr.msk.bf16.mxu0 %vm1854_vm11, %v4072_v45 }
 0x1db   : > { %v1298_v63 = vsel %vm3970_vm2, 0.0, %v625_v39  ;;  %v1378_v25 = vrot.slane %v625_v39, 7  ;;  %v4076_v61 = vmax.f32 %v556_v38, 0.0  ;;  %vm4198_vm2 = vcmp.eq.s32.totalorder %v4940_v30, 0 }
 0x1dc   : > { %v1531_v14 = vrot.slane %v1298_v63, 1  ;;  %v1296_v37 = vsel %vm3980_vm3, 0.0, %v4062_v12  ;;  %v624_v48 = vmax.f32 %v548_v19, 0.0  ;;  %vm4209_vm3 = vcmp.eq.s32.totalorder %v4943_v1, 0 }
 0x1dd   : > { %v1527_v38 = vrot.slane %v1296_v37, 1  ;;  %v1171_v0 = vsel %vm3991_vm4, 0.0, %v4076_v61  ;;  %v1533_v51 = vrot.slane %v4076_v61, 1  ;;  %v1458_v63 = vpack.c.bf16 %v4076_v61, %v625_v39 }
 0x1de   : > { %v4101_v44 = vrot.slane %v1171_v0, 7  ;;  %v1169_v19 = vsel %vm4002_vm7, 0.0, %v624_v48  ;;  %v1529_v59 = vrot.slane %v624_v48, 1  ;;  %v3092_v7 = vpop.f32.mrb[20].mxu0  ;;  %v1457_v8 = vpack.c.bf16 %v624_v48, %v4062_v12 }
 0x1df   : > { %v4106_v9 = vrot.slane %v1169_v19, 7  ;;  %v569_v37 = vadd.f32 %v3092_v7, %v3666_v58  ;;  %1641 = vrot.lane.b32.xlu1 %v1458_v63, %s3472_s21  ;;  %v560_v46 = vpop.f32.mrb[21].mxu0  ;;  %v1534_v40 = vsel %vm1495_vm5, %v1531_v14, %v1533_v51  ;;  %v4112_v39 = vsel %vm1495_vm5, %v1525_v43, %v1527_v38 }
 0x1e0   : > { %4920 = vst [vmem:[#allocation30_spill] sm:$0xff] %v4112_v39  ;;  %v561_v48 = vadd.f32 %v3666_v58, %v560_v46  ;;  %v3093_v0 = vpop.f32.mrb[22].mxu0  ;;  %1639 = vrot.lane.b32.xlu0 %v1457_v8, %s3472_s21  ;;  %v1530_v7 = vsel %vm1495_vm5, %v1527_v38, %v1529_v59  ;;  %v1532_v63 = vsel %vm1495_vm5, %v1529_v59, %v1531_v14  ;;  %v4924_v19 = vand.u32 15, %v3954_v16 }
 0x1e1   : > { %v629_v22 = vmax.f32 %v569_v37, 0.0  ;;  %v572_v50 = vadd.f32 %v3093_v0, %v3666_v58  ;;  %v563_v46 = vpop.f32.mrb[23].mxu0  ;;  %v1598_v29 = vpack.c.bf16 %v1532_v63, %v1530_v7  ;;  %v4927_v8 = vand.u32 15, %v3957_v23 }
 0x1e2   : > { %vm4126_vm14 = vcmp.eq.s32.totalorder %v4924_v19, 0  ;;  %v4141_v16 = vsel %vm1342_vm6, %v4106_v9, %v1378_v25  ;;  %v4143_v14 = vmax.f32 %v561_v48, 0.0  ;;  %v564_v59 = vadd.f32 %v3666_v58, %v563_v46 }
 0x1e3   : > { %vm4135_vm15 = vcmp.eq.s32.totalorder %v4927_v8, 0  ;;  %4930 = vst [vmem:[#allocation31_spill] sm:$0xff] %v4141_v16  ;;  %v4148_v37 = vsel %vm1342_vm6, %v1378_v25, %v4101_v44  ;;  %v4932_v0 = vrot.slane %v4062_v12, 7  ;;  %v1302_v7 = vsel %vm4040_vm8, 0.0, %v629_v22  ;;  %1687 = vrot.lane.b32.xlu1 %v1598_v29, %s3473_s9 }
 0x1e4   : > { %4931 = vst [vmem:[#allocation32_spill] sm:$0xff] %v4148_v37  ;;  %v4158_v63 = vmax.f32 %v572_v50, 0.0  ;;  %v4934_v48 = vand.u32 15, %v3960_v24  ;;  %v879_v25 = vand.u32 15, %v4023_v55  ;;  %v1386_v8 = vrot.slane %v629_v22, 7 }
 0x1e5   : > { %v4154_v23 = vsel %vm1342_vm6, %v4060_v5, %v4932_v0  ;;  %v1539_v0 = vrot.slane %v1302_v7, 1  ;;  %v1300_v50 = vsel %vm4053_vm9, 0.0, %v4143_v14  ;;  %v628_v42 = vmax.f32 %v564_v59, 0.0  ;;  %v4276_v24 = vld [vmem:[%s4810_s2] sm:$0x3f]  }
 0x1e6   : > { %4933 = vst [vmem:[#allocation33_spill] sm:$0xff] %v4154_v23  ;;  %vm4163_vm0 = vcmp.eq.s32.totalorder %v4934_v48, 15  ;;  %v4937_v29 = vand.u32 15, %v3964_v28  ;;  %v1535_v48 = vrot.slane %v1300_v50, 1  ;;  %v1175_v55 = vsel %vm4065_vm10, 0.0, %v4158_v63  ;;  %v3096_v28 = vpop.f32.mrb[24].mxu0 }
 0x1e7   : > { %v1541_v46 = vrot.slane %v4158_v63, 1  ;;  %v1460_v7 = vpack.c.bf16 %v4158_v63, %v629_v22  ;;  %v4184_v26 = vrot.slane %v1175_v55, 7  ;;  %v1173_v36 = vsel %vm4078_vm12, 0.0, %v628_v42  ;;  %v576_v37 = vpop.f32.mrb[25].mxu0 }
 0x1e8   : > { %vm4175_vm1 = vcmp.eq.s32.totalorder %v4937_v29, 15  ;;  %v1537_v59 = vrot.slane %v628_v42, 1  ;;  %v1459_v29 = vpack.c.bf16 %v628_v42, %v4143_v14  ;;  %v4189_v16 = vrot.slane %v1173_v36, 7  ;;  %v3097_v55 = vpop.f32.mrb[26].mxu0 }
 0x1e9   : > { %v585_v50 = vadd.f32 %v3096_v28, %v3666_v58  ;;  %1645 = vrot.lane.b32.xlu0 %v1460_v7, %s3472_s21  ;;  %v1536_v17 = vsel %vm1495_vm5, %v1533_v51, %v1535_v48  ;;  %v1542_v22 = vsel %vm1495_vm5, %v1539_v0, %v1541_v46  ;;  %v577_v63 = vadd.f32 %v3666_v58, %v576_v37  ;;  %v579_v7 = vpop.f32.mrb[27].mxu0 }
 0x1ea   : > { %v1599_v54 = vpack.c.bf16 %v1536_v17, %v1534_v40  ;;  %v1538_v42 = vsel %vm1495_vm5, %v1535_v48, %v1537_v59  ;;  %v1540_v36 = vsel %vm1495_vm5, %v1537_v59, %v1539_v0  ;;  %v588_v51 = vadd.f32 %v3097_v55, %v3666_v58 }
 0x1eb   : > { %v4204_v28 = vmax.f32 %v585_v50, 0.0  ;;  %v1600_v47 = vpack.c.bf16 %v1540_v36, %v1538_v42  ;;  %v4946_v30 = vrot.slane %v4062_v12, 7  ;;  %v4219_v48 = vmax.f32 %v577_v63, 0.0 }
 0x1ec   : > { %v580_v0 = vadd.f32 %v3666_v58, %v579_v7  ;;  %1689 = vrot.lane.b32.xlu1 %v1599_v54, %s3473_s9  ;;  %v4948_v59 = vand.u32 15, %v4014_v2  ;;  %v4233_v12 = vsel %vm1342_vm6, %v4189_v16, %v1386_v8  ;;  %v4241_v2 = vmax.f32 %v588_v51, 0.0 }
 0x1ed   : > { %v4217_v40 = vsel %vm1342_vm6, %v4946_v30, %v4106_v9  ;;  %v1306_v50 = vsel %vm4126_vm14, 0.0, %v4204_v28  ;;  %vm4243_vm7 = vcmp.eq.s32.totalorder %v879_v25, 15  ;;  %v4249_v63 = vsel %vm1342_vm6, %v1386_v8, %v4184_v26 }
 0x1ee   : > { %4947 = vst [vmem:[#allocation34_spill] sm:$0xff] %v4217_v40  ;;  %vm4225_vm4 = vcmp.eq.s32.totalorder %v4948_v59, 15  ;;  %v1547_v54 = vrot.slane %v1306_v50, 1  ;;  %v1304_v42 = vsel %vm4135_vm15, 0.0, %v4219_v48  ;;  %v632_v36 = vmax.f32 %v580_v0, 0.0  ;;  %v3100_v50 = vpop.f32.mrb[28].mxu0 }
 0x1ef   : > { %v1543_v51 = vrot.slane %v1304_v42, 1  ;;  %v1549_v25 = vrot.slane %v4241_v2, 1  ;;  %v1462_v7 = vpack.c.bf16 %v4241_v2, %v4204_v28  ;;  %v1179_v8 = vsel %vm4163_vm0, 0.0, %v4241_v2  ;;  %v592_v18 = vpop.f32.mrb[29].mxu0 }
 0x1f0   : > { %v1545_v59 = vrot.slane %v632_v36, 1  ;;  %1643 = vrot.lane.b32.xlu1 %v1459_v29, %s3472_s21  ;;  %v1461_v38 = vpack.c.bf16 %v632_v36, %v4219_v48  ;;  %v1177_v0 = vsel %vm4175_vm1, 0.0, %v632_v36  ;;  %v601_v42 = vadd.f32 %v3100_v50, %v3666_v58  ;;  %v3101_v19 = vpop.f32.mrb[30].mxu0 }
 0x1f1   : > { %v1544_v43 = vsel %vm1495_vm5, %v1541_v46, %v1543_v51  ;;  %v1550_v30 = vsel %vm1495_vm5, %v1547_v54, %v1549_v25  ;;  %v593_v9 = vadd.f32 %v3666_v58, %v592_v18  ;;  %v604_v50 = vadd.f32 %v3101_v19, %v3666_v58  ;;  %v595_v46 = vpop.f32.mrb[31].mxu0 }
 0x1f2   : > { %v1601_v2 = vpack.c.bf16 %v1544_v43, %v1542_v22  ;;  %v1546_v55 = vsel %vm1495_vm5, %v1543_v51, %v1545_v59  ;;  %v1548_v29 = vsel %vm1495_vm5, %v1545_v59, %v1547_v54  ;;  %v4278_v36 = vmax.f32 %v601_v42, 0.0 }
 0x1f3   : > { %v1602_v23 = vpack.c.bf16 %v1548_v29, %v1546_v55  ;;  %v1445_v18 = vpack.c.bf16 %v4249_v63, %v4233_v12  ;;  %v1396_v40 = vrot.slane %v1179_v8, 7  ;;  %v635_v22 = vmax.f32 %v593_v9, 0.0 }
 0x1f4   : > { %v596_v43 = vadd.f32 %v3666_v58, %v595_v46  ;;  %1693 = vrot.lane.b32.xlu0 %v1601_v2, %s3473_s9  ;;  %1691 = vrot.lane.b32.xlu1 %v1600_v47, %s3473_s9  ;;  %v1856_v54 = vsel %vm1854_vm11, %v4072_v45, 0  ;;  %v1392_v51 = vrot.slane %v1177_v0, 7  ;;  %v1310_v59 = vsel %vm4198_vm2, 0.0, %v4278_v36 }
 0x1f5   : > { %v638_v55 = vmax.f32 %v604_v50, 0.0  ;;  %3239 = vmatpush3.bf16.msra.mxu1 %v1856_v54  ;;  %v4953_v42 = vrot.slane %v4143_v14, 7  ;;  %3103 = vmatpush3.bf16.msra.mxu0 %v1856_v54  ;;  %v1555_v58 = vrot.slane %v1310_v59, 1  ;;  %v1308_v47 = vsel %vm4209_vm3, 0.0, %v635_v22 }
 0x1f6   : > { %v1398_v8 = vrot.slane %v635_v22, 7  ;;  %v636_v45 = vmax.f32 %v596_v43, 0.0  ;;  %3306 = vmatprep.subr.msk.bf16.mxu1 %vm1854_vm11, %v4276_v24  ;;  %v1551_v39 = vrot.slane %v1308_v47, 1  ;;  %vm1750_vm8 = vcmask 64512  }
 0x1f7   : > { %v4295_v9 = vsel %vm1342_vm6, %v4101_v44, %v4953_v42  ;;  %v1183_v0 = vsel %vm4225_vm4, 0.0, %v638_v55  ;;  %v1796_v19 = vrot.slane %v638_v55, 1  ;;  %v1794_v2 = vpack.c.bf16 %v638_v55, %v4278_v36 }
 0x1f8   : > { %v4304_v29 = vrot.slane %v1183_v0, 7  ;;  %v1181_v44 = vsel %vm4243_vm7, 0.0, %v636_v45  ;;  %v1553_v50 = vrot.slane %v636_v45, 1  ;;  %1649 = vrot.lane.b32.xlu0 %v1462_v7, %s3472_s21  ;;  %1647 = vrot.lane.b32.xlu1 %v1461_v38, %s3472_s21  ;;  %v1463_v37 = vpack.c.bf16 %v636_v45, %v635_v22 }
 0x1f9   : > { %v1400_v46 = vrot.slane %v1181_v44, 7  ;;  %v1552_v43 = vsel %vm1495_vm5, %v1549_v25, %v1551_v39  ;;  %v1797_v1 = vsel %vm1495_vm5, %v1555_v58, %v1796_v19  ;;  %v1800_v54 = vsel %vm1495_vm5, %v1796_v19, 0.0 }
 0x1fa   : > { %v1603_v59 = vpack.c.bf16 %v1552_v43, %v1550_v30  ;;  %v1554_v55 = vsel %vm1495_vm5, %v1551_v39, %v1553_v50  ;;  %v1556_v42 = vsel %vm1495_vm5, %v1553_v50, %v1555_v58  ;;  %v1801_v17 = vpack.c.bf16 %v1800_v54, %v1797_v1 }
 0x1fb   : > { %v4954_v7 = vsel %vm4116_vm13, 0.0, %v4011_v41  ;;  %v1604_v38 = vpack.c.bf16 %v1556_v42, %v1554_v55  ;;  %v4955_v22 = vrot.slane %v4143_v14, 7  ;;  %v4956_v45 = vrot.slane %v4204_v28, 7 }
 0x1fc   : > { %v1368_v47 = vrot.slane %v4954_v7, 7  ;;  %v1370_v58 = vrot.slane %v3977_v49, 7  ;;  %v1787_v39 = vrot.slane %v4278_v36, 7  ;;  %1697 = vrot.lane.b32.xlu0 %v1603_v59, %s3473_s9  ;;  %1695 = vrot.lane.b32.xlu1 %v1602_v23, %s3473_s9  ;;  %v4958_v19 = vrot.slane %v4219_v48, 7 }
 0x1fd   : > { %v4323_v25 = vsel %vm1342_vm6, %v4955_v22, %v4189_v16  ;;  %v4328_v30 = vsel %vm1342_vm6, %v1392_v51, %v4956_v45  ;;  %v4957_v14 = vmov %v4956_v45  ;;  %v4355_v50 = vsel %vm1342_vm6, %v1396_v40, %v1398_v8  ;;  %v4984_v22 = vld [vmem:[#allocation27_spill] sm:$0xff] }
 0x1fe   : > { %v1444_v61 = vpack.c.bf16 %v4323_v25, %v4295_v9  ;;  %v4339_v16 = vsel %vm1342_vm6, %v4957_v14, %v1396_v40  ;;  %v4347_v36 = vsel %vm1342_vm6, %v4184_v26, %v4958_v19  ;;  %v4959_v44 = vmov %v4958_v19  ;;  %v4988_v14 = vld [vmem:[#allocation34_spill] sm:$0xff]  ;;  %v4989_v19 = vld [vmem:[#allocation33_spill] sm:$0xff] }
 0x1ff   : > { %v1447_v0 = vpack.c.bf16 %v4339_v16, %v4328_v30  ;;  %v4352_v23 = vsel %vm1342_vm6, %v4959_v44, %v1392_v51  ;;  %v4360_v43 = vsel %vm1342_vm6, %v1398_v8, %v1400_v46  ;;  %v4363_v1 = vsel %vm1342_vm6, %v1400_v46, %v1787_v39 }
 0x200   : > { %v1446_v28 = vpack.c.bf16 %v4352_v23, %v4347_v36  ;;  %v4367_v26 = vsel %vm1342_vm6, %v1787_v39, %v4304_v29  ;;  %v1448_v48 = vpack.c.bf16 %v4360_v43, %v4355_v50  ;;  %v4960_v51 = vrot.slane %v3988_v53, 7  ;;  %1699 = vrot.lane.b32.xlu0 %v1604_v38, %s3473_s9  ;;  %1651 = vrot.lane.b32.xlu1 %v1463_v37, %s3472_s21  ;;  %v4983_v38 = vld [vmem:[#allocation30_spill] sm:$0xff] }
 0x201   : > { %v1793_v40 = vpack.c.bf16 %v4367_v26, %v4363_v1  ;;  %v4379_v8 = vsel %vm1342_vm6, %v1368_v47, %v1370_v58  ;;  %v4387_v59 = vsel %vm1342_vm6, %v1370_v58, %v4060_v5  ;;  %v1588_v42 = vsel %vm1495_vm5, 0.0, %v3706_v21  ;;  %v4986_v58 = vld [vmem:[#allocation25_spill] sm:$0xff] }
 0x202   : > { %v4376_v54 = vsel %vm1342_vm6, %v4960_v51, %v1368_v47  ;;  %v1441_v55 = vpack.c.bf16 %v4387_v59, %v4379_v8  ;;  %v4961_v37 = vpack.c.bf16 %v3704_v20, %v3690_v11  ;;  %v3474_v7 = vmov 0.0|0.0  }
 0x203   : > { %v1440_v46 = vpack.c.bf16 %v4376_v54, %v4086_v52  ;;  %v3475_v5 = vmov 0.0   ;;  %v4963_v21 = vpack.c.bf16 %v3789_v10, %v3773_v62  ;;  %v4964_v11 = vpack.c.bf16 %v3697_v15, %v3679_v6  ;;  %v4970_v62 = vld [vmem:[#allocation19_spill] sm:$0xff]  ;;  %v4971_v10 = vld [vmem:[#allocation12_spill] sm:$0xff] }
 0x204   : > { %1806 = vrot.lane.b32.xlu0 %v1801_v17, %s3473_s9  ;;  %1803 = vrot.lane.b32.xlu1 %v1794_v2, %s3472_s21  ;;  %v1589_v47 = vpack.c.bf16 %v1588_v42, %v3475_v5  ;;  %v4962_v17 = vpack.c.bf16 %v3731_v35, %v3728_v34  ;;  %v4965_v20 = vpack.c.bf16 %v3816_v33, %v3813_v31  ;;  %v4974_v31 = vld [vmem:[#allocation17_spill] sm:$0xff]  ;;  %vm1701_vm5 = vcmask 31744  }
 0x205   : > { %v4966_v34 = vpack.c.bf16 %v3804_v27, %v3723_v32  ;;  %v4967_v35 = vpack.c.bf16 %v3876_v57, %v3859_v13  ;;  %v4968_v6 = vpack.c.bf16 %v3782_v4, %v3765_v56  ;;  %v4969_v15 = vpack.c.bf16 %v3907_v60, %v3904_v3  ;;  %v4973_v27 = vld [vmem:[#allocation18_spill] sm:$0xff]  ;;  %v4977_v4 = vld [vmem:[#allocation29_spill] sm:$0xff]  ;;  %v4978_v13 = vld [vmem:[#allocation28_spill] sm:$0xff] }
 0x206   : > { %v4972_v32 = vpack.c.bf16 %v4970_v62, %v4971_v10  ;;  %v4975_v33 = vpack.c.bf16 %v4973_v27, %v4974_v31  ;;  %v4976_v56 = vpack.c.bf16 %v4011_v41, %v3988_v53  ;;  %v4979_v57 = vpack.c.bf16 %v4977_v4, %v4978_v13  ;;  %v4980_v3 = vld [vmem:[#allocation26_spill] sm:$0xff]  ;;  %v4981_v60 = vld [vmem:[#allocation20_spill] sm:$0xff] }
 0x207   : > { %v4982_v2 = vpack.c.bf16 %v4980_v3, %v4981_v60  ;;  %v4985_v45 = vpack.c.bf16 %v4983_v38, %v4984_v22  ;;  %v4987_v53 = vpack.c.bf16 %v4986_v58, %v3977_v49  ;;  %vm1821_vm9 = vcmask 97280   ;;  %v4991_v49 = vld [vmem:[#allocation32_spill] sm:$0xff]  ;;  %v4995_v3 = vld [vmem:[#allocation10_spill] sm:$0xff] }
 0x208   : > { %1623 = vrot.lane.b32.xlu0 %v4961_v37, %s3472_s21  ;;  %1621 = vrot.lane.b32.xlu1 %v3474_v7, %s3472_s21  ;;  %v4990_v44 = vpack.c.bf16 %v4988_v14, %v4989_v19  ;;  %v2191_v23 = vsel %vm1342_vm6, %v4304_v29, 0.0  ;;  %v4994_v29 = vld [vmem:[#allocation9_spill] sm:$0xff]  ;;  %v5000_v19 = vld [vmem:[#allocation8_spill] sm:$0xff]  ;;  %vm2548_vm6 = vcmask 1041408  }
 0x209   : > { %v2192_v43 = vpack.c.bf16 %v3475_v5, %v2191_v23  ;;  %v4996_v60 = vpack.c.bf16 %v4994_v29, %v4995_v3 }
 0x20c   : > { %1671 = vrot.lane.b32.xlu0 %v4962_v17, %s3473_s9  ;;  %1669 = vrot.lane.b32.xlu1 %v1589_v47, %s3473_s9  ;;  %v4992_v47 = vld [vmem:[#allocation31_spill] sm:$0xff] }
 0x210   : > { %1627 = vrot.lane.b32.xlu0 %v4963_v21, %s3472_s21  ;;  %1625 = vrot.lane.b32.xlu1 %v4964_v11, %s3472_s21  ;;  %v2027_v11 = vsel %vm1854_vm11, %v4276_v24, 0 }
 0x214   : > { %1675 = vrot.lane.b32.xlu0 %v4965_v20, %s3473_s9  ;;  %1673 = vrot.lane.b32.xlu1 %v4966_v34, %s3473_s9  ;;  %v3366_v20 = vld [vmem:[%s4810_s2 + $0x10] sm:$0x3f]  }
 0x215   : > { %v2210_v22 = vsel %vm1854_vm11, %v3366_v20, 0 }
 0x218   : > { %1631 = vrot.lane.b32.xlu0 %v4967_v35, %s3472_s21  ;;  %1629 = vrot.lane.b32.xlu1 %v4968_v6, %s3472_s21 }
 0x21c   : > { %1679 = vrot.lane.b32.xlu0 %v4969_v15, %s3473_s9  ;;  %1677 = vrot.lane.b32.xlu1 %v4972_v32, %s3473_s9 }
 0x220   : > { %1633 = vrot.lane.b32.xlu1 %v4975_v33, %s3472_s21  ;;  %1635 = vrot.lane.b32.xlu0 %v4976_v56, %s3472_s21 }
 0x224   : > { %1683 = vrot.lane.b32.xlu0 %v4979_v57, %s3473_s9  ;;  %1681 = vrot.lane.b32.xlu1 %v4982_v2, %s3473_s9 }
 0x228   : > { %1685 = vrot.lane.b32.xlu0 %v4985_v45, %s3473_s9  ;;  %1637 = vrot.lane.b32.xlu1 %v4987_v53, %s3472_s21  ;;  %v4997_v53 = vld [vmem:[#allocation15_spill] sm:$0xff] }
 0x22c   : > { %2193 = vrot.lane.b32.xlu1 %v3474_v7, %s3473_s9  ;;  %v4993_v7 = vpack.c.bf16 %v4991_v49, %v4992_v47  ;;  %s296_s9 = scalar_lea.vmem [#allocation5], %s2883_s17 }
 0x22d   : > { %s2803_s8 = sshll.u32 %s296_s9, 4  ;;  %s4758_s8 = int_to_ptr.vmem [resolvable:$true] %s2803_s8 }
 0x22e   : > { %s3401_s12 = scalar_lea.vmem %s4758_s8, 512  ;;  %p3408_p8 = scmp.lt.s32.totalorder %s4758_s8, %s3406_s23 }
 0x22f   : > { %p3402_p6 = scmp.ne.s32.totalorder %s4758_s8, %s3401_s12  ;;  %p3409_p10 = scmp.lt.s32.totalorder %s3407_s29, %s3401_s12 }
 0x231   : > { %p3403_p12 = pnand %p3402_p6, %p5012_p11  ;;  %p3410_p0 = por %p3409_p10, %p3408_p8 }
 0x233   : > { %p3404_p13 = pneg %p3403_p12 }
 0x235   : > { %p3411_p2 = pnand %p3410_p0, %p3404_p13 }
 0x251   : > { %v1642_v41 = vpop.permute.xlu1 %1641 }
 0x252   : > { %v1640_v39 = vpop.permute.xlu0 %1639  ;;  %v1734_v17 = vsel %vm1701_vm5, %v4993_v7, %v1642_v41  ;;  %v4998_v41 = vld [vmem:[#allocation13_spill] sm:$0xff] }
 0x253   : > { %v1731_v51 = vsel %vm1701_vm5, %v4990_v44, %v1640_v39  ;;  %v4999_v39 = vpack.c.bf16 %v4997_v53, %v4998_v41  ;;  %v5001_v44 = vld [vmem:[#allocation11_spill] sm:$0xff] }
 0x255   : > { %v1688_v42 = vpop.permute.xlu1 %1687 }
 0x256   : > { %v4468_v37 = vsel %vm1750_vm8, %v1731_v51, %v1688_v42  ;;  %v5002_v51 = vpack.c.bf16 %v5000_v19, %v5001_v44 }
 0x257   : > { %3120 = vmatprep.mubr.msk.bf16.mxu1 %vm1821_vm9, %v4468_v37 }
 0x25b   : > { %v1646_v35 = vpop.permute.xlu0 %1645 }
 0x25c   : > { %v1740_v24 = vsel %vm1701_vm5, %v1445_v18, %v1646_v35  ;;  %v5004_v35 = vld [vmem:[#allocation21_spill] sm:$0xff] }
 0x25e   : > { %v1690_v21 = vpop.permute.xlu1 %1689 }
 0x25f   : > { %v4482_v34 = vsel %vm1750_vm8, %v1734_v17, %v1690_v21 }
 0x260   : > { %3121 = vmatmul.mubr.msk.bf16.vlgmr.msra.gmra.mrb[0].mxu1 %vm1821_vm9, %v4482_v34 }
 0x261   : > { %3137 = vmatpush3.bf16.msra.mxu1 %v2027_v11 }
 0x262   : > { %v1644_v6 = vpop.permute.xlu1 %1643  ;;  %3307 = vmatprep.subr.msk.bf16.mxu1 %vm1854_vm11, %v3366_v20  ;;  %v5003_v20 = vld [vmem:[#allocation23_spill] sm:$0xff] }
 0x263   : > { %v1737_v15 = vsel %vm1701_vm5, %v1444_v61, %v1644_v6  ;;  %v5005_v6 = vpack.c.bf16 %v5003_v20, %v5004_v35 }
 0x266   : > { %v1694_v62 = vpop.permute.xlu0 %1693  ;;  %v1692_v10 = vpop.permute.xlu1 %1691 }
 0x267   : > { %v4496_v32 = vsel %vm1750_vm8, %v1740_v24, %v1694_v62  ;;  %v4499_v27 = vsel %vm1750_vm8, %v1737_v15, %v1692_v10  ;;  %v5006_v15 = vld [vmem:[#allocation14_spill] sm:$0xff]  ;;  %v5007_v62 = vld [vmem:[#allocation16_spill] sm:$0xff] }
 0x268   : > { %3124 = vmatprep.mubr.msk.bf16.mxu1 %vm1821_vm9, %v4499_v27  ;;  %v5008_v10 = vpack.c.bf16 %v5006_v15, %v5007_v62 }
 0x269   : > { %3125 = vmatmul.mubr.msk.bf16.gmra.mrb[4].mxu1 %vm1821_vm9, %v4496_v32 }
 0x26a   : > { %v1650_v12 = vpop.permute.xlu0 %1649  ;;  %v1648_v63 = vpop.permute.xlu1 %1647 }
 0x26b   : > { %v1746_v18 = vsel %vm1701_vm5, %v1447_v0, %v1650_v12  ;;  %v1743_v9 = vsel %vm1701_vm5, %v1446_v28, %v1648_v63 }
 0x26e   : > { %v1698_v25 = vpop.permute.xlu0 %1697  ;;  %v1696_v61 = vpop.permute.xlu1 %1695 }
 0x26f   : > { %v4514_v31 = vsel %vm1750_vm8, %v1746_v18, %v1698_v25  ;;  %v4517_v33 = vsel %vm1750_vm8, %v1743_v9, %v1696_v61 }
 0x270   : > { %3128 = vmatprep.mubr.msk.bf16.mxu1 %vm1821_vm9, %v4517_v33 }
 0x271   : > { %3129 = vmatmul.mubr.msk.bf16.gmra.mrb[8].mxu1 %vm1821_vm9, %v4514_v31 }
 0x272   : > { %v1700_v30 = vpop.permute.xlu0 %1699  ;;  %v1652_v16 = vpop.permute.xlu1 %1651 }
 0x273   : > { %v1749_v0 = vsel %vm1701_vm5, %v1448_v48, %v1652_v16  ;;  %v5009_v16 = vld [vmem:[#allocation22_spill] sm:$0xff] }
 0x274   : > { %v4528_v36 = vsel %vm1750_vm8, %v1749_v0, %v1700_v30  ;;  %v5010_v0 = vld [vmem:[#allocation24_spill] sm:$0xff] }
 0x275   : > { %3132 = vmatprep.mubr.msk.bf16.mxu1 %vm1821_vm9, %v4528_v36  ;;  %v5011_v23 = vpack.c.bf16 %v5009_v16, %v5010_v0 }
 0x276   : > { %v1807_v28 = vpop.permute.xlu0 %1806  ;;  %v1804_v56 = vpop.permute.xlu1 %1803 }
 0x277   : > { %v1810_v4 = vsel %vm1701_vm5, %v1793_v40, %v1804_v56 }
 0x278   : > { %v4539_v50 = vsel %vm1750_vm8, %v1810_v4, %v1807_v28 }
 0x279   : > { %3133 = vmatmul.mubr.msk.bf16.gmra.mrb[12].mxu1 %vm1821_vm9, %v4539_v50 }
 0x27a   : > { %v1624_v48 = vpop.permute.xlu0 %1623  ;;  %v1622_v13 = vpop.permute.xlu1 %1621 }
 0x27b   : > { %v4545_v57 = vsel %vm1701_vm5, %v2192_v43, %v1622_v13  ;;  %v1707_v1 = vsel %vm1701_vm5, %v4996_v60, %v1624_v48  ;;  %v1704_v26 = vsel %vm1701_vm5, 0.0|0.0, %v1622_v13 }
 0x27e   : > { %v1672_v40 = vpop.permute.xlu0 %1671  ;;  %v1670_v2 = vpop.permute.xlu1 %1669 }
 0x27f   : > { %v1754_v38 = vsel %vm1750_vm8, %v1707_v1, %v1672_v40  ;;  %v1752_v5 = vsel %vm1750_vm8, %v1704_v26, %v1670_v2 }
 0x280   : > { %3104 = vmatprep.mubr.msk.bf16.mxu0 %vm1821_vm9, %v1754_v38  ;;  %3138 = vmatprep.mubr.msk.bf16.mxu1 %vm1821_vm9, %v1752_v5 }
 0x281   : > { %3139 = vmatmul.mubr.msk.bf16.vlgmr.msra.gmra.mrb[16].mxu1 %vm1821_vm9, %v1754_v38 }
 0x282   : > { %3171 = vmatpush3.bf16.msra.mxu1 %v2210_v22  ;;  %v1628_v45 = vpop.permute.xlu0 %1627  ;;  %v1626_v58 = vpop.permute.xlu1 %1625 }
 0x283   : > { %v1713_v14 = vsel %vm1701_vm5, %v4999_v39, %v1628_v45  ;;  %v1710_v42 = vsel %vm1701_vm5, %v5002_v51, %v1626_v58  ;;  %v4661_v45 = vld [vmem:[%s4813_s5] ss:$0 sm:$0xff] }
 0x286   : > { %v1676_v49 = vpop.permute.xlu0 %1675  ;;  %v1674_v47 = vpop.permute.xlu1 %1673 }
 0x287   : > { %v1758_v7 = vsel %vm1750_vm8, %v1713_v14, %v1676_v49  ;;  %v1756_v17 = vsel %vm1750_vm8, %v1710_v42, %v1674_v47 }
 0x288   : > { %3105 = vmatmul.mubr.msk.bf16.vlgmr.msra.gmra.mrb[32].mxu0 %vm1821_vm9, %v1756_v17  ;;  %3142 = vmatprep.mubr.msk.bf16.mxu1 %vm1821_vm9, %v1756_v17 }
 0x289   : > { %3108 = vmatprep.mubr.msk.bf16.mxu0 %vm1821_vm9, %v1758_v7  ;;  %3143 = vmatmul.mubr.msk.bf16.gmra.mrb[20].mxu1 %vm1821_vm9, %v1758_v7 }
 0x28a   : > { %v1632_v21 = vpop.permute.xlu0 %1631  ;;  %v1630_v11 = vpop.permute.xlu1 %1629 }
 0x28b   : > { %v1719_v24 = vsel %vm1701_vm5, %v5005_v6, %v1632_v21  ;;  %v1716_v12 = vsel %vm1701_vm5, %v5008_v10, %v1630_v11 }
 0x28e   : > { %v1680_v63 = vpop.permute.xlu0 %1679  ;;  %v1678_v18 = vpop.permute.xlu1 %1677 }
 0x28f   : > { %v1762_v9 = vsel %vm1750_vm8, %v1719_v24, %v1680_v63  ;;  %v1760_v25 = vsel %vm1750_vm8, %v1716_v12, %v1678_v18 }
 0x290   : > { %3109 = vmatmul.mubr.msk.bf16.gmra.mrb[36].mxu0 %vm1821_vm9, %v1760_v25  ;;  %3146 = vmatprep.mubr.msk.bf16.mxu1 %vm1821_vm9, %v1760_v25 }
 0x291   : > { %3112 = vmatprep.mubr.msk.bf16.mxu0 %vm1821_vm9, %v1762_v9  ;;  %3147 = vmatmul.mubr.msk.bf16.gmra.mrb[24].mxu1 %vm1821_vm9, %v1762_v9 }
 0x292   : > { %v1634_v61 = vpop.permute.xlu1 %1633  ;;  %v1636_v30 = vpop.permute.xlu0 %1635 }
 0x293   : > { %v1722_v28 = vsel %vm1701_vm5, %v5011_v23, %v1634_v61  ;;  %v1725_v56 = vsel %vm1701_vm5, %v1440_v46, %v1636_v30  ;;  %v2492_v46 = vld [vmem:[%s4811_s3] sm:$0x3] }
 0x294   : > { %3308 = vmatprep.subr.msk.bf16.mxu0 %vm2548_vm6, %v2492_v46  ;;  %v2550_v59 = vsel %vm2548_vm6, %v2492_v46, 0 }
 0x295   : > { %3205 = vmatpush3.bf16.msra.mxu0 %v2550_v59 }
 0x296   : > { %v1684_v4 = vpop.permute.xlu0 %1683  ;;  %v1682_v43 = vpop.permute.xlu1 %1681 }
 0x297   : > { %v1766_v48 = vsel %vm1750_vm8, %v1725_v56, %v1684_v4  ;;  %v1764_v13 = vsel %vm1750_vm8, %v1722_v28, %v1682_v43 }
 0x298   : > { %3113 = vmatmul.mubr.msk.bf16.gmra.mrb[40].mxu0 %vm1821_vm9, %v1764_v13  ;;  %3150 = vmatprep.mubr.msk.bf16.mxu1 %vm1821_vm9, %v1764_v13 }
 0x299   : > { %3116 = vmatprep.mubr.msk.bf16.mxu0 %vm1821_vm9, %v1766_v48  ;;  %3151 = vmatmul.mubr.msk.bf16.gmra.mrb[28].mxu1 %vm1821_vm9, %v1766_v48 }
 0x29a   : > { %v1686_v29 = vpop.permute.xlu0 %1685  ;;  %v1638_v3 = vpop.permute.xlu1 %1637 }
 0x29b   : > { %v1728_v52 = vsel %vm1701_vm5, %v1441_v55, %v1638_v3 }
 0x29c   : > { %v1768_v54 = vsel %vm1750_vm8, %v1728_v52, %v1686_v29 }
 0x29d   : > { %3154 = vmatprep.mubr.msk.bf16.mxu1 %vm1821_vm9, %v1768_v54 }
 0x29e   : > { %v2194_v8 = vpop.permute.xlu1 %2193 }
 0x29f   : > { %v2198_v55 = vsel %vm1750_vm8, %v4545_v57, %v2194_v8 }
 0x2a0   : > { %3117 = vmatmul.mubr.msk.bf16.gmra.mrb[44].mxu0 %vm1821_vm9, %v1768_v54 }
 0x2a1   : > { %3155 = vmatmul.mubr.msk.bf16.gmra.mrb[0].mxu1 %vm1821_vm9, %v4468_v37 }
 0x2a2   : > { %3158 = vmatprep.mubr.msk.bf16.mxu1 %vm1821_vm9, %v4482_v34 }
 0x2a9   : > { %3159 = vmatmul.mubr.msk.bf16.gmra.mrb[4].mxu1 %vm1821_vm9, %v4499_v27 }
 0x2aa   : > { %3162 = vmatprep.mubr.msk.bf16.mxu1 %vm1821_vm9, %v4496_v32 }
 0x2b1   : > { %3163 = vmatmul.mubr.msk.bf16.gmra.mrb[8].mxu1 %vm1821_vm9, %v4517_v33 }
 0x2b2   : > { %3166 = vmatprep.mubr.msk.bf16.mxu1 %vm1821_vm9, %v4514_v31 }
 0x2b9   : > { %3167 = vmatmul.mubr.msk.bf16.gmra.mrb[12].mxu1 %vm1821_vm9, %v4528_v36 }
 0x2ba   : > { %3172 = vmatprep.mubr.msk.bf16.mxu1 %vm1821_vm9, %v1756_v17 }
 0x2c1   : > { %3173 = vmatmul.mubr.msk.bf16.vlgmr.msra.gmra.mrb[16].mxu1 %vm1821_vm9, %v1758_v7 }
 0x2c2   : > { %3176 = vmatprep.mubr.msk.bf16.mxu1 %vm1821_vm9, %v1760_v25 }
 0x2c9   : > { %3177 = vmatmul.mubr.msk.bf16.gmra.mrb[20].mxu1 %vm1821_vm9, %v1762_v9 }
 0x2ca   : > { %3180 = vmatprep.mubr.msk.bf16.mxu1 %vm1821_vm9, %v1764_v13 }
 0x2d1   : > { %3181 = vmatmul.mubr.msk.bf16.gmra.mrb[24].mxu1 %vm1821_vm9, %v1766_v48 }
 0x2d2   : > { %3184 = vmatprep.mubr.msk.bf16.mxu1 %vm1821_vm9, %v1768_v54 }
 0x2d9   : > { %3185 = vmatmul.mubr.msk.bf16.gmra.mrb[28].mxu1 %vm1821_vm9, %v4468_v37 }
 0x2da   : > { %3188 = vmatprep.mubr.msk.bf16.mxu1 %vm1821_vm9, %v4482_v34 }
 0x2e1   : > { %3189 = vmatmul.mubr.msk.bf16.gmra.mrb[0].mxu1 %vm1821_vm9, %v4499_v27 }
 0x2e2   : > { %3192 = vmatprep.mubr.msk.bf16.mxu1 %vm1821_vm9, %v4496_v32 }
 0x2e9   : > { %3193 = vmatmul.mubr.msk.bf16.gmra.mrb[4].mxu1 %vm1821_vm9, %v4517_v33 }
 0x2ea   : > { %3196 = vmatprep.mubr.msk.bf16.mxu1 %vm1821_vm9, %v4514_v31 }
 0x2f1   : > { %3197 = vmatmul.mubr.msk.bf16.gmra.mrb[8].mxu1 %vm1821_vm9, %v4528_v36 }
 0x2f2   : > { %3200 = vmatprep.mubr.msk.bf16.mxu1 %vm1821_vm9, %v4539_v50 }
 0x2f9   : > { %3201 = vmatmul.mubr.msk.bf16.gmra.mrb[12].mxu1 %vm1821_vm9, %v2198_v55 }
 0x35b   : > { %v3106_v37 = vpop.f32.mrb[32].mxu0 }
 0x35c   : > { %v1892_v34 = vpop.f32.mrb[33].mxu0 }
 0x35d   : > { %v3107_v32 = vpop.f32.mrb[34].mxu0 }
 0x35e   : > { %v1895_v27 = vpop.f32.mrb[35].mxu0 }
 0x363   : > { %v3110_v31 = vpop.f32.mrb[36].mxu0 }
 0x364   : > { %v1908_v33 = vpop.f32.mrb[37].mxu0 }
 0x365   : > { %v3111_v36 = vpop.f32.mrb[38].mxu0 }
 0x366   : > { %v1911_v50 = vpop.f32.mrb[39].mxu0 }
 0x36b   : > { %v3114_v60 = vpop.f32.mrb[40].mxu0 }
 0x36c   : > { %v1924_v1 = vpop.f32.mrb[41].mxu0 }
 0x36d   : > { %v3115_v26 = vpop.f32.mrb[42].mxu0 }
 0x36e   : > { %v1927_v40 = vpop.f32.mrb[43].mxu0 }
 0x373   : > { %v4650_v2 = vpop.f32.mrb[44].mxu0 }
 0x374   : > { %v4652_v38 = vpop.f32.mrb[45].mxu0 }
 0x375   : > { %v4654_v57 = vpop.f32.mrb[46].mxu0 }
 0x376   : > { %v4656_v5 = vpop.f32.mrb[47].mxu0 }
 0x394   : > { %v3174_v22 = vpop.f32.mrb[16].mxu1 }
 0x395   : > { %v3240_v58 = vadd.f32 %v3174_v22, %v3106_v37  ;;  %v2246_v53 = vpop.f32.mrb[17].mxu1 }
 0x396   : > { %v3241_v41 = vadd.f32 %v2246_v53, %v1892_v34  ;;  %v3175_v39 = vpop.f32.mrb[18].mxu1 }
 0x397   : > { %v2414_v14 = vadd.f32 %v3240_v58, %v4661_v45  ;;  %v3242_v19 = vadd.f32 %v3175_v39, %v3107_v32  ;;  %v2249_v44 = vpop.f32.mrb[19].mxu1 }
 0x398   : > { %v2412_v51 = vadd.f32 %v3241_v41, %v4661_v45  ;;  %v3243_v42 = vadd.f32 %v2249_v44, %v1895_v27 }
 0x399   : > { %v2415_v49 = vadd.f32 %v3242_v19, %v4661_v45  ;;  %v2446_v7 = vmax.f32 %v2414_v14, 0.0 }
 0x39a   : > { %v2413_v47 = vadd.f32 %v3243_v42, %v4661_v45  ;;  %v2444_v21 = vmax.f32 %v2412_v51, 0.0 }
 0x39b   : > { %v2447_v17 = vmax.f32 %v2415_v49, 0.0 }
 0x39c   : > { %v2445_v11 = vmax.f32 %v2413_v47, 0.0  ;;  %v3178_v20 = vpop.f32.mrb[20].mxu1 }
 0x39d   : > { %v2477_v35 = vpack.c.bf16 %v2447_v17, %v2446_v7  ;;  %v3244_v6 = vadd.f32 %v3178_v20, %v3110_v31  ;;  %v2262_v24 = vpop.f32.mrb[21].mxu1 }
 0x39e   : > { %v2476_v15 = vpack.c.bf16 %v2445_v11, %v2444_v21  ;;  %v3245_v62 = vadd.f32 %v2262_v24, %v1908_v33  ;;  %v3179_v10 = vpop.f32.mrb[22].mxu1 }
 0x39f   : > { %v2418_v12 = vadd.f32 %v3244_v6, %v4661_v45  ;;  %v3246_v63 = vadd.f32 %v3179_v10, %v3111_v36  ;;  %v2265_v18 = vpop.f32.mrb[23].mxu1 }
 0x3a0   : > { %v2416_v9 = vadd.f32 %v3245_v62, %v4661_v45  ;;  %v3247_v25 = vadd.f32 %v2265_v18, %v1911_v50  ;;  %3206 = vmatprep.mubr.msk.bf16.mxu0 %vm1701_vm5, %v2476_v15 }
 0x3a1   : > { %v2419_v61 = vadd.f32 %v3246_v63, %v4661_v45  ;;  %3207 = vmatmul.mubr.msk.bf16.vlgmr.msra.gmra.mrb[48].mxu0 %vm1701_vm5, %v2477_v35  ;;  %v2450_v16 = vmax.f32 %v2418_v12, 0.0 }
 0x3a2   : > { %v2417_v30 = vadd.f32 %v3247_v25, %v4661_v45  ;;  %v2448_v23 = vmax.f32 %v2416_v9, 0.0 }
 0x3a3   : > { %v2451_v0 = vmax.f32 %v2419_v61, 0.0 }
 0x3a4   : > { %v2449_v28 = vmax.f32 %v2417_v30, 0.0  ;;  %v3182_v56 = vpop.f32.mrb[24].mxu1 }
 0x3a5   : > { %v2479_v4 = vpack.c.bf16 %v2451_v0, %v2450_v16  ;;  %v3248_v43 = vadd.f32 %v3182_v56, %v3114_v60  ;;  %v2278_v48 = vpop.f32.mrb[25].mxu1 }
 0x3a6   : > { %v2478_v13 = vpack.c.bf16 %v2449_v28, %v2448_v23  ;;  %v3249_v29 = vadd.f32 %v2278_v48, %v1924_v1  ;;  %v3183_v3 = vpop.f32.mrb[26].mxu1 }
 0x3a7   : > { %v2422_v52 = vadd.f32 %v3248_v43, %v4661_v45  ;;  %v3250_v54 = vadd.f32 %v3183_v3, %v3115_v26  ;;  %v2281_v8 = vpop.f32.mrb[27].mxu1 }
 0x3a8   : > { %v2420_v46 = vadd.f32 %v3249_v29, %v4661_v45  ;;  %v3251_v59 = vadd.f32 %v2281_v8, %v1927_v40  ;;  %3210 = vmatprep.mubr.msk.bf16.mxu0 %vm1701_vm5, %v2478_v13 }
 0x3a9   : > { %v2423_v55 = vadd.f32 %v3250_v54, %v4661_v45  ;;  %3211 = vmatmul.mubr.msk.bf16.gmra.mrb[52].mxu0 %vm1701_vm5, %v2479_v4  ;;  %v2454_v34 = vmax.f32 %v2422_v52, 0.0 }
 0x3aa   : > { %v2421_v37 = vadd.f32 %v3251_v59, %v4661_v45  ;;  %v2452_v27 = vmax.f32 %v2420_v46, 0.0 }
 0x3ab   : > { %v2455_v32 = vmax.f32 %v2423_v55, 0.0 }
 0x3ac   : > { %v2453_v31 = vmax.f32 %v2421_v37, 0.0  ;;  %v3186_v33 = vpop.f32.mrb[28].mxu1 }
 0x3ad   : > { %v2481_v36 = vpack.c.bf16 %v2455_v32, %v2454_v34  ;;  %v3252_v50 = vadd.f32 %v3186_v33, %v4650_v2  ;;  %v2294_v60 = vpop.f32.mrb[29].mxu1 }
 0x3ae   : > { %v2480_v1 = vpack.c.bf16 %v2453_v31, %v2452_v27  ;;  %v3253_v26 = vadd.f32 %v2294_v60, %v4652_v38  ;;  %v3187_v40 = vpop.f32.mrb[30].mxu1 }
 0x3af   : > { %v2426_v22 = vadd.f32 %v3252_v50, %v4661_v45  ;;  %v3254_v58 = vadd.f32 %v3187_v40, %v4654_v57  ;;  %v2297_v53 = vpop.f32.mrb[31].mxu1 }
 0x3b0   : > { %v2424_v41 = vadd.f32 %v3253_v26, %v4661_v45  ;;  %v3255_v39 = vadd.f32 %v2297_v53, %v4656_v5  ;;  %3214 = vmatprep.mubr.msk.bf16.mxu0 %vm1701_vm5, %v2480_v1 }
 0x3b1   : > { %v2427_v14 = vadd.f32 %v3254_v58, %v4661_v45  ;;  %3215 = vmatmul.mubr.msk.bf16.gmra.mrb[56].mxu0 %vm1701_vm5, %v2481_v36  ;;  %v2458_v19 = vmax.f32 %v2426_v22, 0.0 }
 0x3b2   : > { %v2425_v2 = vadd.f32 %v3255_v39, %v4661_v45  ;;  %v2456_v44 = vmax.f32 %v2424_v41, 0.0 }
 0x3b3   : > { %v2459_v38 = vmax.f32 %v2427_v14, 0.0 }
 0x3b4   : > { %v2457_v51 = vmax.f32 %v2425_v2, 0.0  ;;  %v3190_v42 = vpop.f32.mrb[0].mxu1  ;;  %v4718_v2 = vld [vmem:[%s4814_s6] ss:$0 sm:$0xff] }
 0x3b5   : > { %v2483_v49 = vpack.c.bf16 %v2459_v38, %v2458_v19  ;;  %v2430_v57 = vadd.f32 %v3190_v42, %v4661_v45  ;;  %v2310_v47 = vpop.f32.mrb[1].mxu1 }
 0x3b6   : > { %v2482_v7 = vpack.c.bf16 %v2457_v51, %v2456_v44  ;;  %v2428_v5 = vadd.f32 %v4661_v45, %v2310_v47  ;;  %v3191_v17 = vpop.f32.mrb[2].mxu1 }
 0x3b7   : > { %v2431_v21 = vadd.f32 %v3191_v17, %v4661_v45  ;;  %v2313_v11 = vpop.f32.mrb[3].mxu1  ;;  %v2462_v35 = vmax.f32 %v2430_v57, 0.0 }
 0x3b8   : > { %v2429_v20 = vadd.f32 %v4661_v45, %v2313_v11  ;;  %3218 = vmatprep.mubr.msk.bf16.mxu0 %vm1701_vm5, %v2482_v7  ;;  %v2460_v24 = vmax.f32 %v2428_v5, 0.0 }
 0x3b9   : > { %v2463_v6 = vmax.f32 %v2431_v21, 0.0  ;;  %3219 = vmatmul.mubr.msk.bf16.gmra.mrb[60].mxu0 %vm1701_vm5, %v2483_v49 }
 0x3ba   : > { %v2461_v15 = vmax.f32 %v2429_v20, 0.0 }
 0x3bb   : > { %v2485_v62 = vpack.c.bf16 %v2463_v6, %v2462_v35 }
 0x3bc   : > { %v2484_v10 = vpack.c.bf16 %v2461_v15, %v2460_v24  ;;  %v3194_v12 = vpop.f32.mrb[4].mxu1 }
 0x3bd   : > { %v2434_v63 = vadd.f32 %v3194_v12, %v4661_v45  ;;  %v2326_v18 = vpop.f32.mrb[5].mxu1 }
 0x3be   : > { %v2432_v9 = vadd.f32 %v4661_v45, %v2326_v18  ;;  %v3195_v25 = vpop.f32.mrb[6].mxu1  ;;  %3222 = vmatprep.mubr.msk.bf16.mxu0 %vm1701_vm5, %v2484_v10 }
 0x3bf   : > { %v2435_v61 = vadd.f32 %v3195_v25, %v4661_v45  ;;  %v2329_v30 = vpop.f32.mrb[7].mxu1  ;;  %v2466_v0 = vmax.f32 %v2434_v63, 0.0 }
 0x3c0   : > { %v2433_v16 = vadd.f32 %v4661_v45, %v2329_v30  ;;  %v2464_v28 = vmax.f32 %v2432_v9, 0.0 }
 0x3c1   : > { %v2467_v23 = vmax.f32 %v2435_v61, 0.0  ;;  %3223 = vmatmul.mubr.msk.bf16.gmra.mrb[64].mxu0 %vm1701_vm5, %v2485_v62 }
 0x3c2   : > { %v2465_v56 = vmax.f32 %v2433_v16, 0.0 }
 0x3c3   : > { %v2487_v4 = vpack.c.bf16 %v2467_v23, %v2466_v0 }
 0x3c4   : > { %v2486_v43 = vpack.c.bf16 %v2465_v56, %v2464_v28  ;;  %v3198_v48 = vpop.f32.mrb[8].mxu1 }
 0x3c5   : > { %v2438_v13 = vadd.f32 %v3198_v48, %v4661_v45  ;;  %v2342_v29 = vpop.f32.mrb[9].mxu1 }
 0x3c6   : > { %v2436_v3 = vadd.f32 %v4661_v45, %v2342_v29  ;;  %v3199_v52 = vpop.f32.mrb[10].mxu1  ;;  %3226 = vmatprep.mubr.msk.bf16.mxu0 %vm1701_vm5, %v2486_v43 }
 0x3c7   : > { %v2439_v54 = vadd.f32 %v3199_v52, %v4661_v45  ;;  %v2345_v8 = vpop.f32.mrb[11].mxu1  ;;  %v2470_v59 = vmax.f32 %v2438_v13, 0.0 }
 0x3c8   : > { %v2437_v46 = vadd.f32 %v4661_v45, %v2345_v8  ;;  %v2468_v37 = vmax.f32 %v2436_v3, 0.0 }
 0x3c9   : > { %v2471_v55 = vmax.f32 %v2439_v54, 0.0  ;;  %3227 = vmatmul.mubr.msk.bf16.gmra.mrb[68].mxu0 %vm1701_vm5, %v2487_v4 }
 0x3ca   : > { %v2469_v34 = vmax.f32 %v2437_v46, 0.0 }
 0x3cb   : > { %v2489_v32 = vpack.c.bf16 %v2471_v55, %v2470_v59 }
 0x3cc   : > { %v2488_v27 = vpack.c.bf16 %v2469_v34, %v2468_v37  ;;  %v3202_v31 = vpop.f32.mrb[12].mxu1 }
 0x3cd   : > { %v2442_v33 = vadd.f32 %v3202_v31, %v4661_v45  ;;  %v2358_v36 = vpop.f32.mrb[13].mxu1 }
 0x3ce   : > { %v2440_v50 = vadd.f32 %v4661_v45, %v2358_v36  ;;  %v3203_v60 = vpop.f32.mrb[14].mxu1  ;;  %3230 = vmatprep.mubr.msk.bf16.mxu0 %vm1701_vm5, %v2488_v27 }
 0x3cf   : > { %v2443_v1 = vadd.f32 %v3203_v60, %v4661_v45  ;;  %v2361_v26 = vpop.f32.mrb[15].mxu1  ;;  %v2474_v22 = vmax.f32 %v2442_v33, 0.0 }
 0x3d0   : > { %v2441_v40 = vadd.f32 %v4661_v45, %v2361_v26  ;;  %v2472_v53 = vmax.f32 %v2440_v50, 0.0 }
 0x3d1   : > { %v2475_v58 = vmax.f32 %v2443_v1, 0.0  ;;  %3231 = vmatmul.mubr.msk.bf16.gmra.mrb[72].mxu0 %vm1701_vm5, %v2489_v32 }
 0x3d2   : > { %v2473_v41 = vmax.f32 %v2441_v40, 0.0 }
 0x3d3   : > { %v2491_v39 = vpack.c.bf16 %v2475_v58, %v2474_v22 }
 0x3d4   : > { %v2490_v14 = vpack.c.bf16 %v2473_v41, %v2472_v53 }
 0x3d6   : > { %3234 = vmatprep.mubr.msk.bf16.mxu0 %vm1701_vm5, %v2490_v14 }
 0x3d9   : > { %3235 = vmatmul.mubr.msk.bf16.gmra.mrb[76].mxu0 %vm1701_vm5, %v2491_v39 }
 0x474   : > { %v3208_v19 = vpop.f32.mrb[48].mxu0 }
 0x475   : > { %v2586_v38 = vpop.f32.mrb[49].mxu0  ;;  %v2595_v47 = vadd.f32 %v3208_v19, %v4718_v2 }
 0x476   : > { %v2587_v45 = vadd.f32 %v4718_v2, %v2586_v38  ;;  %v3209_v44 = vpop.f32.mrb[50].mxu0 }
 0x477   : > { %v2589_v51 = vpop.f32.mrb[51].mxu0  ;;  %v2598_v17 = vadd.f32 %v3209_v44, %v4718_v2 }
 0x478   : > { %2713 = vxpose.xlu0.b32.start [1/16] (narrow) %v2587_v45, 16  ;;  %v2590_v42 = vadd.f32 %v4718_v2, %v2589_v51  ;;  %v3367_v45 = vld [vmem:[%s3629_s15] sm:$0xff] }
 0x47c   : > { %v3212_v49 = vpop.f32.mrb[52].mxu0  ;;  %2714 = vxpose.xlu0.b32.cont [2/16] (narrow) %v2590_v42, 16 }
 0x47d   : > { %v2602_v57 = vpop.f32.mrb[53].mxu0  ;;  %v2611_v10 = vadd.f32 %v3212_v49, %v4718_v2 }
 0x47e   : > { %v3213_v7 = vpop.f32.mrb[54].mxu0  ;;  %v2603_v20 = vadd.f32 %v4718_v2, %v2602_v57 }
 0x47f   : > { %v2605_v5 = vpop.f32.mrb[55].mxu0  ;;  %v2614_v18 = vadd.f32 %v3213_v7, %v4718_v2  ;;  %v3369_v7 = vld [vmem:[%s3629_s15 + $0x8] sm:$0xff] }
 0x480   : > { %2715 = vxpose.xlu0.b32.cont [3/16] (narrow) %v2595_v47, 16  ;;  %v2606_v24 = vadd.f32 %v4718_v2, %v2605_v5 }
 0x484   : > { %v3216_v21 = vpop.f32.mrb[56].mxu0  ;;  %2716 = vxpose.xlu0.b32.cont [4/16] (narrow) %v2598_v17, 16 }
 0x485   : > { %v2618_v11 = vpop.f32.mrb[57].mxu0  ;;  %v2627_v43 = vadd.f32 %v3216_v21, %v4718_v2 }
 0x486   : > { %v3217_v35 = vpop.f32.mrb[58].mxu0  ;;  %v2619_v61 = vadd.f32 %v4718_v2, %v2618_v11  ;;  %v3370_v11 = vld [vmem:[%s3629_s15 + $0x18] sm:$0xff] }
 0x487   : > { %v2621_v6 = vpop.f32.mrb[59].mxu0  ;;  %v2630_v3 = vadd.f32 %v3217_v35, %v4718_v2 }
 0x488   : > { %2717 = vxpose.xlu0.b32.cont [5/16] (narrow) %v2603_v20, 16  ;;  %v2622_v23 = vadd.f32 %v4718_v2, %v2621_v6 }
 0x48c   : > { %2718 = vxpose.xlu0.b32.cont [6/16] (narrow) %v2606_v24, 16  ;;  %v3220_v15 = vpop.f32.mrb[60].mxu0 }
 0x48d   : > { %v2634_v62 = vpop.f32.mrb[61].mxu0  ;;  %v2643_v26 = vadd.f32 %v3220_v15, %v4718_v2 }
 0x48e   : > { %v3221_v12 = vpop.f32.mrb[62].mxu0  ;;  %v2635_v59 = vadd.f32 %v4718_v2, %v2634_v62 }
 0x48f   : > { %v2637_v63 = vpop.f32.mrb[63].mxu0  ;;  %v2646_v14 = vadd.f32 %v3221_v12, %v4718_v2 }
 0x490   : > { %2719 = vxpose.xlu0.b32.cont [7/16] (narrow) %v2611_v10, 16  ;;  %v2638_v33 = vadd.f32 %v4718_v2, %v2637_v63 }
 0x494   : > { %2720 = vxpose.xlu0.b32.cont [8/16] (narrow) %v2614_v18, 16  ;;  %v3224_v9 = vpop.f32.mrb[64].mxu0 }
 0x495   : > { %v2650_v25 = vpop.f32.mrb[65].mxu0  ;;  %v2659_v48 = vadd.f32 %v3224_v9, %v4718_v2 }
 0x496   : > { %v2651_v30 = vadd.f32 %v4718_v2, %v2650_v25  ;;  %v3225_v16 = vpop.f32.mrb[66].mxu0 }
 0x497   : > { %v2653_v0 = vpop.f32.mrb[67].mxu0  ;;  %v2662_v52 = vadd.f32 %v3225_v16, %v4718_v2 }
 0x498   : > { %2721 = vxpose.xlu0.b32.cont [9/16] (narrow) %v2619_v61, 16  ;;  %2745 = vxpose.xlu1.b32.start [1/16] (narrow) %v2651_v30, 16  ;;  %v2654_v28 = vadd.f32 %v4718_v2, %v2653_v0 }
 0x49c   : > { %2722 = vxpose.xlu0.b32.cont [10/16] (narrow) %v2622_v23, 16  ;;  %v3228_v56 = vpop.f32.mrb[68].mxu0  ;;  %2746 = vxpose.xlu1.b32.cont [2/16] (narrow) %v2654_v28, 16 }
 0x49d   : > { %v2666_v4 = vpop.f32.mrb[69].mxu0  ;;  %v2675_v40 = vadd.f32 %v3228_v56, %v4718_v2 }
 0x49e   : > { %v3229_v13 = vpop.f32.mrb[70].mxu0  ;;  %v2667_v55 = vadd.f32 %v4718_v2, %v2666_v4 }
 0x49f   : > { %v2669_v29 = vpop.f32.mrb[71].mxu0  ;;  %v2678_v19 = vadd.f32 %v3229_v13, %v4718_v2 }
 0x4a0   : > { %2723 = vxpose.xlu0.b32.cont [11/16] (narrow) %v2627_v43, 16  ;;  %2747 = vxpose.xlu1.b32.cont [3/16] (narrow) %v2659_v48, 16  ;;  %v2670_v36 = vadd.f32 %v4718_v2, %v2669_v29 }
 0x4a4   : > { %2724 = vxpose.xlu0.b32.cont [12/16] (narrow) %v2630_v3, 16  ;;  %v3232_v54 = vpop.f32.mrb[72].mxu0  ;;  %2748 = vxpose.xlu1.b32.cont [4/16] (narrow) %v2662_v52, 16 }
 0x4a5   : > { %v2691_v8 = vadd.f32 %v3232_v54, %v4718_v2  ;;  %v2682_v46 = vpop.f32.mrb[73].mxu0 }
 0x4a6   : > { %v2683_v37 = vadd.f32 %v4718_v2, %v2682_v46  ;;  %v3233_v34 = vpop.f32.mrb[74].mxu0 }
 0x4a7   : > { %v2694_v32 = vadd.f32 %v3233_v34, %v4718_v2  ;;  %v2685_v27 = vpop.f32.mrb[75].mxu0 }
 0x4a8   : > { %v2686_v31 = vadd.f32 %v4718_v2, %v2685_v27  ;;  %2749 = vxpose.xlu1.b32.cont [5/16] (narrow) %v2667_v55, 16  ;;  %2725 = vxpose.xlu0.b32.cont [13/16] (narrow) %v2635_v59, 16 }
 0x4ac   : > { %2750 = vxpose.xlu1.b32.cont [6/16] (narrow) %v2670_v36, 16  ;;  %2726 = vxpose.xlu0.b32.cont [14/16] (narrow) %v2638_v33, 16  ;;  %v3236_v50 = vpop.f32.mrb[76].mxu0 }
 0x4ad   : > { %v2707_v60 = vadd.f32 %v3236_v50, %v4718_v2  ;;  %v2698_v1 = vpop.f32.mrb[77].mxu0 }
 0x4ae   : > { %v2699_v22 = vadd.f32 %v4718_v2, %v2698_v1  ;;  %v3237_v58 = vpop.f32.mrb[78].mxu0 }
 0x4af   : > { %v2710_v53 = vadd.f32 %v3237_v58, %v4718_v2  ;;  %v2701_v41 = vpop.f32.mrb[79].mxu0 }
 0x4b0   : > { %v2702_v39 = vadd.f32 %v4718_v2, %v2701_v41  ;;  %2751 = vxpose.xlu1.b32.cont [7/16] (narrow) %v2675_v40, 16  ;;  %2727 = vxpose.xlu0.b32.cont [15/16] (narrow) %v2643_v26, 16  ;;  %v3368_v2 = vld [vmem:[%s3629_s15 + $0x10] sm:$0xff] }
 0x4b4   : > { %2752 = vxpose.xlu1.b32.cont [8/16] (narrow) %v2678_v19, 16  ;;  %2728 = vxpose.xlu0.b32.end [16/16] (narrow) %v2646_v14, 16 }
 0x4b8   : > { %2753 = vxpose.xlu1.b32.cont [9/16] (narrow) %v2683_v37, 16 }
 0x4bc   : > { %2754 = vxpose.xlu1.b32.cont [10/16] (narrow) %v2686_v31, 16 }
 0x4c0   : > { %2755 = vxpose.xlu1.b32.cont [11/16] (narrow) %v2691_v8, 16 }
 0x4c4   : > { %2756 = vxpose.xlu1.b32.cont [12/16] (narrow) %v2694_v32, 16 }
 0x4c8   : > { %2757 = vxpose.xlu1.b32.cont [13/16] (narrow) %v2699_v22, 16 }
 0x4cc   : > { %2758 = vxpose.xlu1.b32.cont [14/16] (narrow) %v2702_v39, 16 }
 0x4d0   : > { %2759 = vxpose.xlu1.b32.cont [15/16] (narrow) %v2707_v60, 16 }
 0x4d4   : > { %2760 = vxpose.xlu1.b32.end [16/16] (narrow) %v2710_v53, 16 }
 0x4f8   : > { %v2729_v38 = vpop.trf.xlu0 }
 0x4f9   : > { %v2777_v44 = vadd.f32 %v3367_v45, %v2729_v38 }
 0x4fb   : > { %v2781_v51 = vmax.f32 %v2777_v44, 0.0 }
 0x4fc   : > { %v2730_v42 = vpop.trf.xlu0 }
 0x4fd   : > { %2785 = vst [vmem:[%s296_s9] sm:$0xff] %v2781_v51  ;;  %v2779_v49 = vadd.f32 %v3368_v2, %v2730_v42 }
 0x4ff   : > { %v2783_v57 = vmax.f32 %v2779_v49, 0.0 }
 0x501   : > { %2787 = vst [vmem:[%s296_s9 + $0x10] sm:$0xff] %v2783_v57 }
 0x518   : > { %v2761_v47 = vpop.trf.xlu1 }
 0x519   : > { %v2778_v5 = vadd.f32 %v3369_v7, %v2761_v47 }
 0x51b   : > { %v2782_v17 = vmax.f32 %v2778_v5, 0.0 }
 0x51c   : > { %v2762_v21 = vpop.trf.xlu1 }
 0x51d   : > { %2786 = vst [vmem:[%s296_s9 + $0x8] sm:$0xff] %v2782_v17  ;;  %v2780_v20 = vadd.f32 %v3370_v11, %v2762_v21 }
 0x51f   : > { %v2784_v35 = vmax.f32 %v2780_v20, 0.0 }
 0x521   : > { %2788 = vst [vmem:[%s296_s9 + $0x18] sm:$0xff] %v2784_v35 }
 0x522   : > { %3414 = shalt.err (!%p3411_p2)
}
 0x523   : > { %s3415_s15 = scalar_lea.hbm %s4764_s20, 512  ;;  %s3419_s9 = scalar_lea.hbm %s4815_s7, 1024 }
 0x524   : > { %p3416_p4 = scmp.ne.s32.totalorder %s4764_s20, %s3415_s15  ;;  %p3420_p9 = scmp.lt.u32.totalorder %s4764_s20, %s4815_s7 }
 0x525   : > { %p3421_p1 = scmp.lt.u32.totalorder %s3419_s9, %s3415_s15  ;;  %p3423_p6 = scmp.lt.u32.totalorder %s3415_s15, %s4764_s20 }
 0x526   : > { %p3417_p5 = pnand %p3416_p4, %p5012_p11 }
 0x527   : > { %p3422_p3 = por %p3421_p1, %p3420_p9 }
 0x528   : > { %p3418_p7 = pneg %p3417_p5 }
 0x529   : > { %p3424_p12 = por %p3423_p6, %p3422_p3 }
 0x52b   : > { %p3425_p13 = pnand %p3424_p12, %p3418_p7 }
 0x52d   : > { %3428 = shalt.err (!%p3425_p13)
}
 0x52e   : > { %s3477_s18 = smov 256   ;;  %s3478_s12 = smov 16  }
 0x52f   : > { %3311 = dma.vmem_to_hbm [thread:$0]  (%p5012_p11), %s4758_s8, 512, %s4764_s20, %s2790_s22, %s3477_s18, %s3477_s18, %s3478_s12  }
 0x530 PF: > { %s2818_s28 = sand.u32 1, %s3455_s24   ;;  %p5013_p8 = scmp.ne.s32.totalorder %s4848_s14, 0 }
 0x531   : > { %p5014_p10 = scmp.ge.s32.totalorder %s3467_s27, 2  ;;  %s2819_s23 = scalar_lea.sflag [#allocation4], %s2818_s28 }
 0x533   : > { %p3318_p0 = pnand %p5014_p10, %p5013_p8 }
 0x535   : > { %3450 = dma.done.wait (!%p3318_p0), %s2819_s23, 512  }
 0x536   : > { %3452 = vsyncadd (!%p3318_p0), %s2819_s23, 4294966784  ;;  %p20_p2 = scmp.ge.s32.totalorder %s3544_s30, 4   ;;  %s5015_s24 = smov %s3459_s25 }
 0x537   : > { %s5016_s25 = smov %s3463_s26  ;;  %s5017_s26 = smov %s3556_s10 }
 0x538   : > { %s5018_s27 = smov %s3544_s30  ;;  %22 = sbr.rel (!%p20_p2) target bundleno = 5 (0x5), region = 95 }
 0x53f   :  { %2824 = vsyncpa [#allocation3], 1 }
 0x540   :  { %2826 = vsyncpa [#allocation3 + $0x1], 1 }
 0x541   :  { %2827 = vsyncpa [#allocation4], 1 }
 0x542   :  { %2829 = vsyncpa [#allocation4 + $0x1], 1 }

</bundles_post_ra>
